<compile_context>
chip_gen: v5e
topology: v5e:2x2
jax: 0.10.0
libtpu: 0.0.40
codegen_flags: <defaults>
</compile_context>

<pallas_src>
import jax
import jax.numpy as jnp
from jax.experimental import pallas as pl
from jax.experimental.pallas import tpu as pltpu

LANE = 128
VMEM_LIMIT = 32 * 1024 * 1024  # explicit scoped-VMEM limit, safe on v5e/v6e/v7x


def _round_up(x, m):
    return ((x + m - 1) // m) * m


def _choose_tile(n, tile_n):
    """Tile size: multiple of 128, capped at tile_n, small enough for >=2 tiles."""
    t = max(LANE, _round_up(-(-n // 2), LANE))
    return min(tile_n, t)


# ---------------------------------------------------------------------------
# In-kernel helpers
# ---------------------------------------------------------------------------
def _mlp_logits_tile(x_ref, w1_ref, b1_ref, w2_ref, b2_ref):
    """Standard layout: logits = relu(x @ W1 + b1) @ W2 + b2, (TN, K) f32.

    x / W1 / W2 are bf16 MXU operands; accumulation and elementwise math are
    f32 (v5e has no bf16 VPU path).  No K padding, no sentinel bias columns.
    """
    x = x_ref[...]                                                # (TN, C_in) bf16
    h = jnp.dot(x, w1_ref[...], preferred_element_type=jnp.float32)
    h = jnp.maximum(h + b1_ref[...], 0.0)                         # f32 ReLU
    h = h.astype(jnp.bfloat16)                                    # MXU operand
    o = jnp.dot(h, w2_ref[...], preferred_element_type=jnp.float32)
    return o + b2_ref[...]                                        # (TN, K) f32


def _mlp_logits_t_tile(xt_ref, w1t_ref, b1t_ref, w2t_ref, b2t_ref):
    """Transposed layout (points on lanes): logits^T, (K, TN) f32."""
    xt = xt_ref[...]                                              # (C_in, TN) bf16
    h = jnp.dot(w1t_ref[...], xt, preferred_element_type=jnp.float32)
    h = jnp.maximum(h + b1t_ref[...], 0.0)                        # (C_hid, TN)
    h = h.astype(jnp.bfloat16)
    o = jnp.dot(w2t_ref[...], h, preferred_element_type=jnp.float32)
    return o + b2t_ref[...]                                       # (K, TN) f32


def _ce_tile(logits, labels):
    """CE over a (TN, K) tile with labels (TN, 1); returns (1,1) sum & count.

    ignore_index=-1: labels < 0 contribute 0 loss / 0 count (also used for
    padded points appended when N is ragged).
    """
    valid = labels >= 0
    m = jnp.max(logits, axis=-1, keepdims=True)
    lse = m + jnp.log(jnp.sum(jnp.exp(logits - m), axis=-1, keepdims=True))
    tn, k = logits.shape
    class_ids = jax.lax.broadcasted_iota(jnp.int32, (tn, k), 1)
    picked = jnp.sum(jnp.where(class_ids == labels, logits, 0.0),
                     axis=-1, keepdims=True)
    per_point = jnp.where(valid, lse - picked, 0.0)
    return (jnp.sum(per_point, keepdims=True),
            jnp.sum(valid.astype(jnp.float32), keepdims=True))


def _ce_tile_t(logits_t, labels_row):
    """CE over a transposed (K, TN) tile with lane-dense labels (1, TN)."""
    valid = labels_row >= 0
    m = jnp.max(logits_t, axis=0, keepdims=True)
    lse = m + jnp.log(jnp.sum(jnp.exp(logits_t - m), axis=0, keepdims=True))
    k, tn = logits_t.shape
    class_ids = jax.lax.broadcasted_iota(jnp.int32, (k, tn), 0)
    picked = jnp.sum(jnp.where(class_ids == labels_row, logits_t, 0.0),
                     axis=0, keepdims=True)
    per_point = jnp.where(valid, lse - picked, 0.0)
    return (jnp.sum(per_point, keepdims=True),
            jnp.sum(valid.astype(jnp.float32), keepdims=True))


# ---------------------------------------------------------------------------
# Kernels
# ---------------------------------------------------------------------------
def _backbone_kernel(x_ref, w1_ref, b1_ref, w2_ref, b2_ref, o_ref):
    o_ref[...] = _mlp_logits_tile(
        x_ref, w1_ref, b1_ref, w2_ref, b2_ref).astype(o_ref.dtype)


def _fused_logits_loss_kernel(x_ref, w1_ref, b1_ref, w2_ref, b2_ref, seg_ref,
                              o_ref, loss_ref, cnt_ref, loss_acc, cnt_acc):
    j = pl.program_id(1)

    @pl.when(j == 0)
    def _():
        loss_acc[...] = jnp.zeros_like(loss_acc)
        cnt_acc[...] = jnp.zeros_like(cnt_acc)

    logits = _mlp_logits_tile(x_ref, w1_ref, b1_ref, w2_ref, b2_ref)
    o_ref[...] = logits.astype(o_ref.dtype)
    tile_loss, tile_cnt = _ce_tile(logits, seg_ref[...])
    loss_acc[...] += tile_loss
    cnt_acc[...] += tile_cnt

    @pl.when(j == pl.num_programs(1) - 1)
    def _():
        loss_ref[...] = loss_acc[...]
        cnt_ref[...] = cnt_acc[...]


def _fused_loss_t_kernel(xt_ref, w1t_ref, b1t_ref, w2t_ref, b2t_ref, seg_ref,
                         loss_ref, cnt_ref, loss_acc, cnt_acc):
    j = pl.program_id(1)

    @pl.when(j == 0)
    def _():
        loss_acc[...] = jnp.zeros_like(loss_acc)
        cnt_acc[...] = jnp.zeros_like(cnt_acc)

    logits_t = _mlp_logits_t_tile(xt_ref, w1t_ref, b1t_ref, w2t_ref, b2t_ref)
    tile_loss, tile_cnt = _ce_tile_t(logits_t, seg_ref[...])
    loss_acc[...] += tile_loss
    cnt_acc[...] += tile_cnt

    @pl.when(j == pl.num_programs(1) - 1)
    def _():
        loss_ref[...] = loss_acc[...]
        cnt_ref[...] = cnt_acc[...]


# ---------------------------------------------------------------------------
# Wrappers
# ---------------------------------------------------------------------------
def _prep_params(params):
    w1 = params["w1"].astype(jnp.bfloat16)                    # (C_in, C_hid)
    b1 = params["b1"].reshape(1, -1).astype(jnp.float32)      # (1, C_hid)
    w2 = params["w2"].astype(jnp.bfloat16)                    # (C_hid, K)
    b2 = params["b2"].reshape(1, -1).astype(jnp.float32)      # (1, K)
    return w1, b1, w2, b2


def backbone_forward(feat, params, *, tile_n=1024):
    """Per-point MLP logits (no labels): (N, K) f32 written directly."""
    n, c_in = feat.shape
    w1, b1, w2, b2 = _prep_params(params)
    c_hid, k = params["w2"].shape

    tile_n = _choose_tile(n, tile_n)
    n_pad = _round_up(n, tile_n)
    feat_bf = feat.astype(jnp.bfloat16)
    if n_pad != n:
        feat_bf = jnp.pad(feat_bf, ((0, n_pad - n), (0, 0)))
    grid = (n_pad // tile_n,)

    cost = pl.CostEstimate(
        flops=int(2 * n_pad * (c_in * c_hid + c_hid * k)),
        transcendentals=0,
        bytes_accessed=int(n_pad * c_in * 2 + n_pad * k * 4
                           + w1.size * 2 + w2.size * 2
                           + b1.size * 4 + b2.size * 4),
    )

    logits = pl.pallas_call(
        _backbone_kernel,
        out_shape=jax.ShapeDtypeStruct((n_pad, k), jnp.float32),
        grid_spec=pltpu.PrefetchScalarGridSpec(
            num_scalar_prefetch=0,
            grid=grid,
            in_specs=[
                pl.BlockSpec((tile_n, c_in), lambda i: (i, 0)),
                pl.BlockSpec(w1.shape, lambda i: (0, 0)),
                pl.BlockSpec(b1.shape, lambda i: (0, 0)),
                pl.BlockSpec(w2.shape, lambda i: (0, 0)),
                pl.BlockSpec(b2.shape, lambda i: (0, 0)),
            ],
            out_specs=pl.BlockSpec((tile_n, k), lambda i: (i, 0)),
        ),
        compiler_params=pltpu.CompilerParams(
            dimension_semantics=("parallel",),
            vmem_limit_bytes=VMEM_LIMIT),
        cost_estimate=cost,
    )(feat_bf, w1, b1, w2, b2)
    return logits[:n] if n_pad != n else logits


def fused_logits_loss(feat, segment, params, *, tile_n=1024):
    """Eval with labels: (N, K) logits + mean CE, fused in one kernel."""
    n, c_in = feat.shape
    w1, b1, w2, b2 = _prep_params(params)
    c_hid, k = params["w2"].shape

    tile_n = _choose_tile(n, tile_n)
    n_pad = _round_up(n, 2 * tile_n)        # even tile count -> splits == 2
    n_tiles = n_pad // tile_n
    splits = 2
    tps = n_tiles // splits                 # tiles per split

    feat_bf = feat.astype(jnp.bfloat16)
    seg = segment.reshape(-1, 1).astype(jnp.int32)
    if n_pad != n:
        feat_bf = jnp.pad(feat_bf, ((0, n_pad - n), (0, 0)))
        seg = jnp.pad(seg, ((0, n_pad - n), (0, 0)), constant_values=-1)

    acc_shape = jax.ShapeDtypeStruct((splits, 1, 1), jnp.float32)
    acc_spec = pl.BlockSpec((None, 1, 1), lambda s, j: (s, 0, 0))

    cost = pl.CostEstimate(
        flops=int(2 * n_pad * (c_in * c_hid + c_hid * k)),
        transcendentals=int(n_pad * (k + 1)),
        bytes_accessed=int(n_pad * c_in * 2 + n_pad * 4 + n_pad * k * 4
                           + w1.size * 2 + w2.size * 2
                           + b1.size * 4 + b2.size * 4 + 2 * splits * 4),
    )

    logits, loss_parts, cnt_parts = pl.pallas_call(
        _fused_logits_loss_kernel,
        out_shape=(jax.ShapeDtypeStruct((n_pad, k), jnp.float32),
                   acc_shape, acc_shape),
        grid_spec=pltpu.PrefetchScalarGridSpec(
            num_scalar_prefetch=0,
            grid=(splits, tps),
            in_specs=[
                pl.BlockSpec((tile_n, c_in), lambda s, j: (s * tps + j, 0)),
                pl.BlockSpec(w1.shape, lambda s, j: (0, 0)),
                pl.BlockSpec(b1.shape, lambda s, j: (0, 0)),
                pl.BlockSpec(w2.shape, lambda s, j: (0, 0)),
                pl.BlockSpec(b2.shape, lambda s, j: (0, 0)),
                pl.BlockSpec((tile_n, 1), lambda s, j: (s * tps + j, 0)),
            ],
            out_specs=(
                pl.BlockSpec((tile_n, k), lambda s, j: (s * tps + j, 0)),
                acc_spec, acc_spec),
            scratch_shapes=[pltpu.VMEM((1, 1), jnp.float32),
                            pltpu.VMEM((1, 1), jnp.float32)],
        ),
        compiler_params=pltpu.CompilerParams(
            dimension_semantics=("parallel", "arbitrary"),
            vmem_limit_bytes=VMEM_LIMIT),
        cost_estimate=cost,
    )(feat_bf, w1, b1, w2, b2, seg)

    total = jnp.sum(loss_parts[:, 0, 0])
    count = jnp.sum(cnt_parts[:, 0, 0])
    loss = total / jnp.maximum(count, 1.0)          # mean over valid labels
    seg_logits = logits[:n] if n_pad != n else logits
    return seg_logits, loss


def fused_loss_training(feat, segment, params, *, tile_n=4096):
    """Training: fused backbone + mean CE, transposed layout, loss only.

    Points live on the lane axis (feat as (C_in, N), labels as (1, N)), so the
    CE elementwise/exp work runs over (K, tile_n) instead of a 128-wide padded
    tile and labels travel lane-dense.
    """
    n, c_in = feat.shape
    w1, b1, w2, b2 = _prep_params(params)
    c_hid, k = params["w2"].shape
    w1t = w1.T                                   # (C_hid, C_in) bf16
    b1t = b1.reshape(c_hid, 1)
    w2t = w2.T                                   # (K, C_hid) bf16
    b2t = b2.reshape(k, 1)

    tile_n = _choose_tile(n, tile_n)
    n_pad = _round_up(n, 2 * tile_n)             # even tile count -> splits == 2
    n_tiles = n_pad // tile_n
    splits = 2
    tps = n_tiles // splits

    feat_t = feat.T.astype(jnp.bfloat16)         # transpose fuses with the cast
    seg = segment.reshape(1, -1).astype(jnp.int32)
    if n_pad != n:
        feat_t = jnp.pad(feat_t, ((0, 0), (0, n_pad - n)))
        seg = jnp.pad(seg, ((0, 0), (0, n_pad - n)), constant_values=-1)

    acc_shape = jax.ShapeDtypeStruct((splits, 1, 1), jnp.float32)
    acc_spec = pl.BlockSpec((None, 1, 1), lambda s, j: (s, 0, 0))

    cost = pl.CostEstimate(
        flops=int(2 * n_pad * (c_in * c_hid + c_hid * k)),
        transcendentals=int(n_pad * (k + 1)),
        bytes_accessed=int(n_pad * c_in * 2 + n_pad * 4
                           + w1t.size * 2 + w2t.size * 2
                           + b1t.size * 4 + b2t.size * 4 + 2 * splits * 4),
    )

    loss_parts, cnt_parts = pl.pallas_call(
        _fused_loss_t_kernel,
        out_shape=(acc_shape, acc_shape),
        grid_spec=pltpu.PrefetchScalarGridSpec(
            num_scalar_prefetch=0,
            grid=(splits, tps),
            in_specs=[
                pl.BlockSpec((c_in, tile_n), lambda s, j: (0, s * tps + j)),
                pl.BlockSpec(w1t.shape, lambda s, j: (0, 0)),
                pl.BlockSpec(b1t.shape, lambda s, j: (0, 0)),
                pl.BlockSpec(w2t.shape, lambda s, j: (0, 0)),
                pl.BlockSpec(b2t.shape, lambda s, j: (0, 0)),
                pl.BlockSpec((1, tile_n), lambda s, j: (0, s * tps + j)),
            ],
            out_specs=(acc_spec, acc_spec),
            scratch_shapes=[pltpu.VMEM((1, 1), jnp.float32),
                            pltpu.VMEM((1, 1), jnp.float32)],
        ),
        compiler_params=pltpu.CompilerParams(
            dimension_semantics=("parallel", "arbitrary"),
            vmem_limit_bytes=VMEM_LIMIT),
        cost_estimate=cost,
    )(feat_t, w1t, b1t, w2t, b2t, seg)

    total = jnp.sum(loss_parts[:, 0, 0])
    count = jnp.sum(cnt_parts[:, 0, 0])
    return total / jnp.maximum(count, 1.0)


# ---------------------------------------------------------------------------
# DefaultSegmentor.forward
# ---------------------------------------------------------------------------
def default_segmentor_forward(input_dict, params, *, training=False):
    # TODO(synk): backbone/criteria are config-built in Pointcept; here a
    # concrete 2-layer per-point MLP + mean CE (ignore_index=-1) is used.
    if "condition" in input_dict:
        input_dict = dict(input_dict)
        input_dict["condition"] = input_dict["condition"][0]   # pure glue

    if training:
        loss = fused_loss_training(input_dict["feat"], input_dict["segment"],
                                   params)
        return dict(loss=loss)
    elif "segment" in input_dict:
        seg_logits, loss = fused_logits_loss(input_dict["feat"],
                                             input_dict["segment"], params)
        return dict(loss=loss, seg_logits=seg_logits)
    else:
        return dict(seg_logits=backbone_forward(input_dict["feat"], params))


if __name__ == "__main__":
    # Small shapes; N intentionally not a multiple of 128 (ragged path).
    N, C_IN, C_HID, K = 250, 32, 64, 16

    key = jax.random.PRNGKey(0)
    k_feat, k_w1, k_w2, k_seg = jax.random.split(key, 4)

    feat = jax.random.normal(k_feat, (N, C_IN), dtype=jnp.float32)
    segment = jax.random.randint(k_seg, (N, 1), 0, K, dtype=jnp.int32)
    segment = segment.at[:7, 0].set(-1)          # exercise ignore_index=-1

    params = dict(
        w1=jax.random.normal(k_w1, (C_IN, C_HID), dtype=jnp.float32) * 0.05,
        b1=jnp.zeros((1, C_HID), dtype=jnp.float32),
        w2=jax.random.normal(k_w2, (C_HID, K), dtype=jnp.float32) * 0.05,
        b2=jnp.zeros((1, K), dtype=jnp.float32),
    )

    input_dict = dict(
        feat=feat,
        segment=segment,
        condition=["ScanNet"],                   # mirrors condition[0] glue
    )

    # eval path with labels: fused logits + loss
    out = default_segmentor_forward(input_dict, params, training=False)
    jax.block_until_ready(out["seg_logits"])
    jax.block_until_ready(out["loss"])

    # training path: loss only (logits never hit HBM)
    out_tr = default_segmentor_forward(input_dict, params, training=True)
    jax.block_until_ready(out_tr["loss"])

    # inference path: logits only
    out_inf = default_segmentor_forward(dict(feat=feat, condition=["ScanNet"]),
                                        params, training=False)
    jax.block_until_ready(out_inf["seg_logits"])

    # -------- pure-JAX reference (bf16-rounded operands, f32 accumulation) --
    def r32(x):
        return x.astype(jnp.bfloat16).astype(jnp.float32)

    hp = jax.lax.Precision.HIGHEST
    h_ref = jnp.maximum(
        jnp.dot(r32(feat), r32(params["w1"]), precision=hp) + params["b1"], 0.0)
    logits_ref = (jnp.dot(r32(h_ref), r32(params["w2"]), precision=hp)
                  + params["b2"])
    lse = jax.scipy.special.logsumexp(logits_ref, axis=-1)
    picked = jnp.take_along_axis(logits_ref, jnp.maximum(segment, 0),
                                 axis=-1)[:, 0]
    valid = segment[:, 0] >= 0
    loss_ref = (jnp.sum(jnp.where(valid, lse - picked, 0.0))
                / jnp.maximum(jnp.sum(valid.astype(jnp.float32)), 1.0))

    assert out["seg_logits"].shape == (N, K)
    assert jnp.allclose(out["seg_logits"], logits_ref, atol=2e-3, rtol=2e-3)
    assert jnp.allclose(out["loss"], loss_ref, atol=2e-3, rtol=2e-3)
    assert jnp.allclose(out_tr["loss"], loss_ref, atol=2e-3, rtol=2e-3)
    assert jnp.allclose(out_inf["seg_logits"], logits_ref, atol=2e-3, rtol=2e-3)

    print("KERNEL_OK")
</pallas_src>

<mosaic_0001>
module attributes {stable_mosaic.version = 11 : i64} {
  func.func @_fused_logits_loss_kernel(%arg0: i32, %arg1: i32, %arg2: memref<128x32xbf16, #tpu.memory_space<vmem>>, %arg3: memref<32x64xbf16, #tpu.memory_space<vmem>>, %arg4: memref<1x64xf32, #tpu.memory_space<vmem>>, %arg5: memref<64x16xbf16, #tpu.memory_space<vmem>>, %arg6: memref<1x16xf32, #tpu.memory_space<vmem>>, %arg7: memref<128x1xi32, #tpu.memory_space<vmem>>, %arg8: memref<128x16xf32, #tpu.memory_space<vmem>>, %arg9: memref<1x1x1xf32, #tpu.memory_space<vmem>>, %arg10: memref<1x1x1xf32, #tpu.memory_space<vmem>>, %arg11: memref<1x1xf32, #tpu.memory_space<vmem>>, %arg12: memref<1x1xf32, #tpu.memory_space<vmem>>) attributes {dimension_semantics = [#tpu.dimension_semantics<parallel>, #tpu.dimension_semantics<arbitrary>], iteration_bounds = array<i64: 2, 1>, scalar_prefetch = 0 : i64, scratch_operands = 2 : i64, tpu.core_type = #tpu.core_type<tc>, window_params = [{transform_indices = @transform_0, window_bounds = array<i64: 128, 32>}, {pipeline_mode = #tpu.pipeline_mode<synchronous>, transform_indices = @transform_1, window_bounds = array<i64: 32, 64>}, {pipeline_mode = #tpu.pipeline_mode<synchronous>, transform_indices = @transform_2, window_bounds = array<i64: 1, 64>}, {pipeline_mode = #tpu.pipeline_mode<synchronous>, transform_indices = @transform_3, window_bounds = array<i64: 64, 16>}, {pipeline_mode = #tpu.pipeline_mode<synchronous>, transform_indices = @transform_4, window_bounds = array<i64: 1, 16>}, {transform_indices = @transform_5, window_bounds = array<i64: 128, 1>}, {transform_indices = @transform_6, window_bounds = array<i64: 128, 16>}, {transform_indices = @transform_7, window_bounds = array<i64: 1, 1, 1>}, {transform_indices = @transform_8, window_bounds = array<i64: 1, 1, 1>}]} {
    %c0_i32 = arith.constant 0 : i32
    %0 = arith.cmpi eq, %arg1, %c0_i32 : i32
    %1 = arith.extui %0 : i1 to i32
    %c0_i32_0 = arith.constant 0 : i32
    %2 = arith.cmpi ne, %1, %c0_i32_0 : i32
    scf.if %2 {
      %cst_34 = arith.constant 0.000000e+00 : f32
      %61 = vector.broadcast %cst_34 : f32 to vector<1x1xf32>
      %c0_35 = arith.constant 0 : index
      %c0_36 = arith.constant 0 : index
      %62 = vector.load %arg11[%c0_35, %c0_36] : memref<1x1xf32, #tpu.memory_space<vmem>>, vector<1x1xf32>
      tpu.vector_store %arg11[%c0_35, %c0_36], %61 {strides = array<i32>} : memref<1x1xf32, #tpu.memory_space<vmem>>, vector<1x1xf32>,
      %cst_37 = arith.constant 0.000000e+00 : f32
      %63 = vector.broadcast %cst_37 : f32 to vector<1x1xf32>
      %c0_38 = arith.constant 0 : index
      %c0_39 = arith.constant 0 : index
      %64 = vector.load %arg12[%c0_38, %c0_39] : memref<1x1xf32, #tpu.memory_space<vmem>>, vector<1x1xf32>
      tpu.vector_store %arg12[%c0_38, %c0_39], %63 {strides = array<i32>} : memref<1x1xf32, #tpu.memory_space<vmem>>, vector<1x1xf32>,
    } else {
    }
    %c0 = arith.constant 0 : index
    %c0_1 = arith.constant 0 : index
    %3 = vector.load %arg2[%c0, %c0_1] : memref<128x32xbf16, #tpu.memory_space<vmem>>, vector<128x32xbf16>
    %c0_2 = arith.constant 0 : index
    %c0_3 = arith.constant 0 : index
    %4 = vector.load %arg3[%c0_2, %c0_3] : memref<32x64xbf16, #tpu.memory_space<vmem>>, vector<32x64xbf16>
    %cst = arith.constant dense<0.000000e+00> : vector<128x64xf32>
    %5 = tpu.matmul %3, %4, %cst {dimension_numbers = #tpu.dot_dimension_numbers<[1], [0], [0], [1], [0, 0, 1, 1], [], []>} : vector<128x32xbf16>, vector<32x64xbf16>, vector<128x64xf32> -> vector<128x64xf32>
    %c0_4 = arith.constant 0 : index
    %c0_5 = arith.constant 0 : index
    %6 = vector.load %arg4[%c0_4, %c0_5] : memref<1x64xf32, #tpu.memory_space<vmem>>, vector<1x64xf32>
    %7 = vector.broadcast %6 : vector<1x64xf32> to vector<128x64xf32>
    %8 = arith.addf %5, %7 : vector<128x64xf32>
    %cst_6 = arith.constant 0.000000e+00 : f32
    %9 = vector.broadcast %cst_6 : f32 to vector<128x64xf32>
    %10 = arith.maximumf %8, %9 : vector<128x64xf32>
    %11 = arith.truncf %10 : vector<128x64xf32> to vector<128x64xbf16>
    %c0_7 = arith.constant 0 : index
    %c0_8 = arith.constant 0 : index
    %12 = vector.load %arg5[%c0_7, %c0_8] : memref<64x16xbf16, #tpu.memory_space<vmem>>, vector<64x16xbf16>
    %cst_9 = arith.constant dense<0.000000e+00> : vector<128x16xf32>
    %13 = tpu.matmul %11, %12, %cst_9 {dimension_numbers = #tpu.dot_dimension_numbers<[1], [0], [0], [1], [0, 0, 1, 1], [], []>} : vector<128x64xbf16>, vector<64x16xbf16>, vector<128x16xf32> -> vector<128x16xf32>
    %c0_10 = arith.constant 0 : index
    %c0_11 = arith.constant 0 : index
    %14 = vector.load %arg6[%c0_10, %c0_11] : memref<1x16xf32, #tpu.memory_space<vmem>>, vector<1x16xf32>
    %15 = vector.broadcast %14 : vector<1x16xf32> to vector<128x16xf32>
    %16 = arith.addf %13, %15 : vector<128x16xf32>
    %c0_12 = arith.constant 0 : index
    %c0_13 = arith.constant 0 : index
    %17 = vector.load %arg8[%c0_12, %c0_13] : memref<128x16xf32, #tpu.memory_space<vmem>>, vector<128x16xf32>
    tpu.vector_store %arg8[%c0_12, %c0_13], %16 {strides = array<i32>} : memref<128x16xf32, #tpu.memory_space<vmem>>, vector<128x16xf32>,
    %c0_14 = arith.constant 0 : index
    %c0_15 = arith.constant 0 : index
    %18 = vector.load %arg7[%c0_14, %c0_15] : memref<128x1xi32, #tpu.memory_space<vmem>>, vector<128x1xi32>
    %c0_i32_16 = arith.constant 0 : i32
    %19 = vector.broadcast %c0_i32_16 : i32 to vector<128x1xi32>
    %20 = arith.cmpi sge, %18, %19 : vector<128x1xi32>
    %cst_17 = arith.constant dense<0xFF800000> : vector<128xf32>
    %21 = vector.multi_reduction <maximumf>, %16, %cst_17 [1] : vector<128x16xf32> to vector<128xf32>
    %22 = vector.shape_cast %21 : vector<128xf32> to vector<128x1xf32>
    %23 = vector.broadcast %22 : vector<128x1xf32> to vector<128x16xf32>
    %24 = arith.subf %16, %23 : vector<128x16xf32>
    %25 = math.exp %24 : vector<128x16xf32>
    %cst_18 = arith.constant dense<0.000000e+00> : vector<128xf32>
    %26 = vector.multi_reduction <add>, %25, %cst_18 [1] : vector<128x16xf32> to vector<128xf32>
    %27 = vector.shape_cast %26 : vector<128xf32> to vector<128x1xf32>
    %28 = math.log %27 : vector<128x1xf32>
    %29 = arith.addf %22, %28 : vector<128x1xf32>
    %30 = tpu.iota {dimensions = array<i32: 1>} : vector<128x16xi32>
    %31 = vector.broadcast %18 : vector<128x1xi32> to vector<128x16xi32>
    %32 = arith.cmpi eq, %30, %31 : vector<128x16xi32>
    %cst_19 = arith.constant 0.000000e+00 : f32
    %33 = vector.broadcast %cst_19 : f32 to vector<128x16xf32>
    %34 = arith.select %32, %16, %33 : vector<128x16xi1>, vector<128x16xf32>
    %cst_20 = arith.constant dense<0.000000e+00> : vector<128xf32>
    %35 = vector.multi_reduction <add>, %34, %cst_20 [1] : vector<128x16xf32> to vector<128xf32>
    %36 = vector.shape_cast %35 : vector<128xf32> to vector<128x1xf32>
    %37 = arith.subf %29, %36 : vector<128x1xf32>
    %cst_21 = arith.constant 0.000000e+00 : f32
    %38 = vector.broadcast %cst_21 : f32 to vector<128x1xf32>
    %39 = arith.select %20, %37, %38 : vector<128x1xi1>, vector<128x1xf32>
    %40 = vector.shape_cast %39 : vector<128x1xf32> to vector<1x128x1xf32>
    %cst_22 = arith.constant dense<0.000000e+00> : vector<1xf32>
    %41 = vector.multi_reduction <add>, %40, %cst_22 [1, 2] : vector<1x128x1xf32> to vector<1xf32>
    %42 = vector.shape_cast %41 : vector<1xf32> to vector<1x1x1xf32>
    %43 = vector.extract %42[0, 0, 0] : f32 from vector<1x1x1xf32>
    %44 = vector.broadcast %43 : f32 to vector<1x1xf32>
    %45 = arith.extui %20 : vector<128x1xi1> to vector<128x1xi32>
    %46 = arith.sitofp %45 : vector<128x1xi32> to vector<128x1xf32>
    %47 = vector.shape_cast %46 : vector<128x1xf32> to vector<1x128x1xf32>
    %cst_23 = arith.constant dense<0.000000e+00> : vector<1xf32>
    %48 = vector.multi_reduction <add>, %47, %cst_23 [1, 2] : vector<1x128x1xf32> to vector<1xf32>
    %49 = vector.shape_cast %48 : vector<1xf32> to vector<1x1x1xf32>
    %50 = vector.extract %49[0, 0, 0] : f32 from vector<1x1x1xf32>
    %51 = vector.broadcast %50 : f32 to vector<1x1xf32>
    %c0_24 = arith.constant 0 : index
    %c0_25 = arith.constant 0 : index
    %52 = vector.load %arg11[%c0_24, %c0_25] : memref<1x1xf32, #tpu.memory_space<vmem>>, vector<1x1xf32>
    %53 = arith.addf %52, %44 : vector<1x1xf32>
    %c0_26 = arith.constant 0 : index
    %c0_27 = arith.constant 0 : index
    %54 = vector.load %arg11[%c0_26, %c0_27] : memref<1x1xf32, #tpu.memory_space<vmem>>, vector<1x1xf32>
    tpu.vector_store %arg11[%c0_26, %c0_27], %53 {strides = array<i32>} : memref<1x1xf32, #tpu.memory_space<vmem>>, vector<1x1xf32>,
    %c0_28 = arith.constant 0 : index
    %c0_29 = arith.constant 0 : index
    %55 = vector.load %arg12[%c0_28, %c0_29] : memref<1x1xf32, #tpu.memory_space<vmem>>, vector<1x1xf32>
    %56 = arith.addf %55, %51 : vector<1x1xf32>
    %c0_30 = arith.constant 0 : index
    %c0_31 = arith.constant 0 : index
    %57 = vector.load %arg12[%c0_30, %c0_31] : memref<1x1xf32, #tpu.memory_space<vmem>>, vector<1x1xf32>
    tpu.vector_store %arg12[%c0_30, %c0_31], %56 {strides = array<i32>} : memref<1x1xf32, #tpu.memory_space<vmem>>, vector<1x1xf32>,
    %c0_i32_32 = arith.constant 0 : i32
    %58 = arith.cmpi eq, %arg1, %c0_i32_32 : i32
    %59 = arith.extui %58 : i1 to i32
    %c0_i32_33 = arith.constant 0 : i32
    %60 = arith.cmpi ne, %59, %c0_i32_33 : i32
    scf.if %60 {
      %c0_34 = arith.constant 0 : index
      %c0_35 = arith.constant 0 : index
      %61 = vector.load %arg11[%c0_34, %c0_35] : memref<1x1xf32, #tpu.memory_space<vmem>>, vector<1x1xf32>
      %c0_36 = arith.constant 0 : index
      %c0_37 = arith.constant 0 : index
      %c0_38 = arith.constant 0 : index
      %62 = vector.load %arg9[%c0_36, %c0_37, %c0_38] : memref<1x1x1xf32, #tpu.memory_space<vmem>>, vector<1x1x1xf32>
      %63 = vector.shape_cast %62 : vector<1x1x1xf32> to vector<1x1xf32>
      %64 = vector.shape_cast %61 : vector<1x1xf32> to vector<1x1x1xf32>
      tpu.vector_store %arg9[%c0_36, %c0_37, %c0_38], %64 {strides = array<i32>} : memref<1x1x1xf32, #tpu.memory_space<vmem>>, vector<1x1x1xf32>,
      %c0_39 = arith.constant 0 : index
      %c0_40 = arith.constant 0 : index
      %65 = vector.load %arg12[%c0_39, %c0_40] : memref<1x1xf32, #tpu.memory_space<vmem>>, vector<1x1xf32>
      %c0_41 = arith.constant 0 : index
      %c0_42 = arith.constant 0 : index
      %c0_43 = arith.constant 0 : index
      %66 = vector.load %arg10[%c0_41, %c0_42, %c0_43] : memref<1x1x1xf32, #tpu.memory_space<vmem>>, vector<1x1x1xf32>
      %67 = vector.shape_cast %66 : vector<1x1x1xf32> to vector<1x1xf32>
      %68 = vector.shape_cast %65 : vector<1x1xf32> to vector<1x1x1xf32>
      tpu.vector_store %arg10[%c0_41, %c0_42, %c0_43], %68 {strides = array<i32>} : memref<1x1x1xf32, #tpu.memory_space<vmem>>, vector<1x1x1xf32>,
    } else {
    }
    return
  }
  func.func @transform_0(%arg0: i32, %arg1: i32) -> (i32, i32) {
    %c1_i32 = arith.constant 1 : i32
    %0 = arith.muli %arg0, %c1_i32 : i32
    %1 = arith.addi %0, %arg1 : i32
    %c0_i32 = arith.constant 0 : i32
    %c0_i32_0 = arith.constant 0 : i32
    return %1, %c0_i32 : i32, i32
  }
  func.func @transform_1(%arg0: i32, %arg1: i32) -> (i32, i32) {
    %c0_i32 = arith.constant 0 : i32
    %c0_i32_0 = arith.constant 0 : i32
    %c0_i32_1 = arith.constant 0 : i32
    return %c0_i32, %c0_i32_0 : i32, i32
  }
  func.func @transform_2(%arg0: i32, %arg1: i32) -> (i32, i32) {
    %c0_i32 = arith.constant 0 : i32
    %c0_i32_0 = arith.constant 0 : i32
    %c0_i32_1 = arith.constant 0 : i32
    return %c0_i32, %c0_i32_0 : i32, i32
  }
  func.func @transform_3(%arg0: i32, %arg1: i32) -> (i32, i32) {
    %c0_i32 = arith.constant 0 : i32
    %c0_i32_0 = arith.constant 0 : i32
    %c0_i32_1 = arith.constant 0 : i32
    return %c0_i32, %c0_i32_0 : i32, i32
  }
  func.func @transform_4(%arg0: i32, %arg1: i32) -> (i32, i32) {
    %c0_i32 = arith.constant 0 : i32
    %c0_i32_0 = arith.constant 0 : i32
    %c0_i32_1 = arith.constant 0 : i32
    return %c0_i32, %c0_i32_0 : i32, i32
  }
  func.func @transform_5(%arg0: i32, %arg1: i32) -> (i32, i32) {
    %c1_i32 = arith.constant 1 : i32
    %0 = arith.muli %arg0, %c1_i32 : i32
    %1 = arith.addi %0, %arg1 : i32
    %c0_i32 = arith.constant 0 : i32
    %c0_i32_0 = arith.constant 0 : i32
    return %1, %c0_i32 : i32, i32
  }
  func.func @transform_6(%arg0: i32, %arg1: i32) -> (i32, i32) {
    %c1_i32 = arith.constant 1 : i32
    %0 = arith.muli %arg0, %c1_i32 : i32
    %1 = arith.addi %0, %arg1 : i32
    %c0_i32 = arith.constant 0 : i32
    %c0_i32_0 = arith.constant 0 : i32
    return %1, %c0_i32 : i32, i32
  }
  func.func @transform_7(%arg0: i32, %arg1: i32) -> (i32, i32, i32) {
    %c0_i32 = arith.constant 0 : i32
    %c0_i32_0 = arith.constant 0 : i32
    %c0_i32_1 = arith.constant 0 : i32
    return %arg0, %c0_i32, %c0_i32_0 : i32, i32, i32
  }
  func.func @transform_8(%arg0: i32, %arg1: i32) -> (i32, i32, i32) {
    %c0_i32 = arith.constant 0 : i32
    %c0_i32_0 = arith.constant 0 : i32
    %c0_i32_1 = arith.constant 0 : i32
    return %arg0, %c0_i32, %c0_i32_0 : i32, i32, i32
  }
}

</mosaic_0001>

<bundles_post_ra>
// kernel: tpu_custom_call.1
= control target key start
LH: loop header
LB: loop body
LE: loop exit
PB: predicated region body
PF: predicated region fallthrough
CT: control target
= control target key end

     0   :  { %s1624_s27 = smov 0   ;;  %s1626_s28 = smov 0   ;;  %s2268_s0 = inlined_call_operand.vmem [shape: bf16[256,32], index: 0, kind: input, shape index: {}]   ;;  %s2269_s1 = inlined_call_operand.vmem [shape: bf16[32,64], index: 1, kind: input, shape index: {}]   ;;  %s2270_s2 = inlined_call_operand.vmem [shape: f32[1,64], index: 2, kind: input, shape index: {}]   ;;  %s2271_s3 = inlined_call_operand.vmem [shape: bf16[64,16], index: 3, kind: input, shape index: {}]   ;;  %s2272_s4 = inlined_call_operand.vmem [shape: f32[1,16], index: 4, kind: input, shape index: {}]   ;;  %s2273_s5 = inlined_call_operand.vmem [shape: s32[256,1], index: 5, kind: input, shape index: {}]   ;;  %s2274_s6 = inlined_call_operand.vmem [shape: f32[256,16], index: 6, kind: output, shape index: {0}]   ;;  %s2275_s7 = inlined_call_operand.vmem [shape: f32[2,1,1], index: 7, kind: output, shape index: {1}]   ;;  %s2276_s8 = inlined_call_operand.vmem [shape: f32[2,1,1], index: 8, kind: output, shape index: {2}]  }
   0x1   :  { %s1628_s29 = smov 0  }
   0x2 LB: > { %s31_s30 = sadd.s32 1, %s1571_s28  ;;  %p1337_p0 = scmp.ge.s32.totalorder %s1575_s29, 1  ;;  %s1575_s29 = sphi %s1628_s29, %s19_s29   ;;  %s1571_s28 = sphi %s1626_s28, %s2278_s28   ;;  %s1567_s27 = sphi %s1624_s27, %s2277_s27  }
   0x3   : > { %p33_p1 = scmp.ge.s32.totalorder %s31_s30, 2  ;;  %p301_p2 = scmp.lt.s32.totalorder %s1575_s29, 3 }
   0x5   : > { %s2280_s30 = smov (%p33_p1, %s31_s30), 0  ;;  %p302_p3 = pnand %p1337_p0, %p301_p2 }
   0x6   : > { %s1338_s11 = sshll.u32 (!%p302_p3), %s1567_s27, 4  ;;  %p373_p5 = scmp.lt.s32.totalorder (!%p302_p3), %s1567_s27, 1 }
   0x7   : > { %305 = sbr.rel (%p302_p3) target bundleno = 872 (0x368), region = 44  ;;  %p351_p4 = scmp.lt.s32.totalorder (!%p302_p3), %s1338_s11, 31 }
   0xc   : > { %v1443_v0 = vld [vmem:[%s2269_s1 + $0x8] sm:$0xff]  ;;  %v1442_v1 = vld [vmem:[%s2269_s1] sm:$0xff]  ;;  %s2282_s11 = smov (!%p351_p4, %s1338_s11), 31  ;;  %vm463_vm0 = vcmask 261120   ;;  %v1447_v10 = vld [vmem:[%s2271_s3 + $0x18] sm:$0xff]  ;;  %v1577_v14 = vmov 0  }
   0xd   : > { %494 = vmatpush.bf16.msra.mxu0 %v1443_v0  ;;  %1448 = vmatpush.bf16.msra.mxu3 %v1443_v0  ;;  %s1339_s14 = sshll.u32 %s2282_s11, 2  ;;  %v1446_v11 = vld [vmem:[%s2271_s3 + $0x10] sm:$0xff]  ;;  %v1445_v12 = vld [vmem:[%s2271_s3 + $0x8] sm:$0xff]  ;;  %v1444_v13 = vld [vmem:[%s2271_s3] sm:$0xff]  ;;  %s1341_s26 = sshll.u32 %s2282_s11, 3  ;;  %v1578_v17 = vmov 0.0  }
   0xe   : > { %s354_s17 = scalar_lea.vmem %s2268_s0, %s1339_s14  ;;  %626 = vmatpush.bf16.msra.mxu1 %v1447_v10  ;;  %1450 = vmatpush.bf16.msra.mxu2 %v1447_v10  ;;  %s1683_s12 = scalar_lea.vmem %s2273_s5, %s1341_s26  ;;  %vm1074_vm2 = vcmask 7168   ;;  %v1699_v20 = vld [vmem:[%s2270_s2] ss:$0 sm:$0xff]  ;;  %vm597_vm4 = vcmask 523264   ;;  %vm671_vm13 = vcmask 130048  }
   0xf   : > { %v1434_v2 = vld [vmem:[%s354_s17] sm:$0xff]  ;;  %v1435_v3 = vld [vmem:[%s354_s17 + $0x8] sm:$0xff]  ;;  %v1436_v4 = vld [vmem:[%s354_s17 + $0x10] sm:$0xff]  ;;  %1484 = vset.pattern.permute.xlu0 %v1577_v14  ;;  %1485 = vset.pattern.permute.xlu1 %v1577_v14  ;;  %s1842_s19 = scalar_lea.vmem %s2274_s6, %s1341_s26  ;;  %s2284_s27 = smov (!%p373_p5, %s1567_s27), 1 }
  0x10   : > { %v1439_v5 = vld [vmem:[%s354_s17 + $0x28] sm:$0xff]  ;;  %v1437_v6 = vld [vmem:[%s354_s17 + $0x18] sm:$0xff]  ;;  %v1440_v7 = vld [vmem:[%s354_s17 + $0x30] sm:$0xff]  ;;  %1486 = vset.pattern.permute.xlu2 %v1577_v14  ;;  %s375_s23 = scalar_lea.vmem %s2275_s7, %s2284_s27  ;;  %s378_s26 = scalar_lea.vmem %s2276_s8, %s2284_s27 }
  0x11   : > { %495 = vmatpush.bf16.msra.mxu0 %v1442_v1  ;;  %1449 = vmatpush.bf16.msra.mxu3 %v1442_v1  ;;  %v1438_v8 = vld [vmem:[%s354_s17 + $0x20] sm:$0xff]  ;;  %v1441_v9 = vld [vmem:[%s354_s17 + $0x38] sm:$0xff]  ;;  %v1694_v19 = vld [vmem:[%s1683_s12 + $0x8] sm:$0xff] }
  0x12   : > { %627 = vmatpush.bf16.msra.mxu1 %v1446_v11  ;;  %1451 = vmatpush.bf16.msra.mxu2 %v1446_v11  ;;  %v1686_v15 = vld [vmem:[%s1683_s12] sm:$0xff]  ;;  %vm705_vm3 = vcmp.ge.s32.totalorder %v1694_v19, 0  ;;  %v1715_v39 = vld [vmem:[%s1683_s12 + $0x10] sm:$0xff]  ;;  %v1718_v40 = vld [vmem:[%s1683_s12 + $0x28] sm:$0xff] }
  0x13   : > { %915 = vperm.xlu0 %1484, %v1686_v15   ;;  %vm704_vm1 = vcmp.ge.s32.totalorder %v1686_v15, 0  ;;  %918 = vperm.xlu1 %1485, %v1694_v19   ;;  %v1417_v22 = vsel %vm705_vm3, 1.0, %v1578_v17  ;;  %vm706_vm5 = vcmp.ge.s32.totalorder %v1715_v39, 0  ;;  %v1724_v41 = vld [vmem:[%s1683_s12 + $0x30] sm:$0xff]  ;;  %v1734_v48 = vld [vmem:[%s1683_s12 + $0x18] sm:$0xff]  ;;  %v1742_v53 = vld [vmem:[%s1683_s12 + $0x40] sm:$0xff] }
  0x14   : > { %1384 = vmatmul.msk.bf16.vlgmr.msra.gmra.mxu0 %vm463_vm0, %v1434_v2  ;;  %1389 = vmatmul.msk.bf16.vlgmr.msra.gmra.mxu3 %vm463_vm0, %v1439_v5  ;;  %v1416_v18 = vsel %vm704_vm1, 1.0, %v1578_v17  ;;  %v1149_v23 = vsel %vm1074_vm2, %v1417_v22, 0.0  ;;  %v1418_v42 = vsel %vm706_vm5, 1.0, %v1578_v17  ;;  %vm707_vm6 = vcmp.ge.s32.totalorder %v1734_v48, 0  ;;  %v1739_v52 = vld [vmem:[%s1683_s12 + $0x50] sm:$0xff]  ;;  %v1756_v57 = vld [vmem:[%s1683_s12 + $0x20] sm:$0xff] }
  0x15   : > { %v1148_v21 = vsel %vm1074_vm2, %v1416_v18, 0.0  ;;  %921 = vperm.xlu2 %1486, %v1715_v39   ;;  %v1151_v43 = vsel %vm1074_vm2, %v1418_v42, 0.0  ;;  %vm709_vm7 = vcmp.ge.s32.totalorder %v1718_v40, 0  ;;  %v1419_v54 = vsel %vm707_vm6, 1.0, %v1578_v17  ;;  %v1766_v0 = vld [vmem:[%s1683_s12 + $0x60] sm:$0xff]  ;;  %v1769_v1 = vld [vmem:[%s1683_s12 + $0x48] sm:$0xff] }
  0x16   : > { %628 = vmatpush.bf16.msra.mxu1 %v1445_v12  ;;  %1452 = vmatpush.bf16.msra.mxu2 %v1445_v12  ;;  %v1150_v24 = vadd.f32 %v1149_v23, %v1148_v21  ;;  %v1421_v55 = vsel %vm709_vm7, 1.0, %v1578_v17  ;;  %v1153_v56 = vsel %vm1074_vm2, %v1419_v54, 0.0  ;;  %vm708_vm8 = vcmp.ge.s32.totalorder %v1756_v57, 0  ;;  %v1783_v10 = vld [vmem:[%s1683_s12 + $0x58] sm:$0xff] }
  0x17   : > { %v1420_v60 = vsel %vm708_vm8, 1.0, %v1578_v17  ;;  %v1157_v61 = vsel %vm1074_vm2, %v1421_v55, 0.0  ;;  %vm710_vm9 = vcmp.ge.s32.totalorder %v1724_v41, 0  ;;  %vm712_vm10 = vcmp.ge.s32.totalorder %v1742_v53, 0  ;;  %v1794_v14 = vld [vmem:[%s1683_s12 + $0x38] sm:$0xff] }
  0x18   : > { %v1152_v44 = vadd.f32 %v1151_v43, %v1150_v24  ;;  %v1155_v62 = vsel %vm1074_vm2, %v1420_v60, 0.0  ;;  %vm713_vm11 = vcmp.ge.s32.totalorder %v1769_v1, 0  ;;  %vm711_vm12 = vcmp.ge.s32.totalorder %v1794_v14, 0 }
  0x19   : > { %v1425_v22 = vsel %vm713_vm11, 1.0, %v1578_v17  ;;  %v1423_v23 = vsel %vm711_vm12, 1.0, %v1578_v17 }
  0x1a   : > { %629 = vmatpush.bf16.msra.mxu1 %v1444_v13  ;;  %1453 = vmatpush.bf16.msra.mxu2 %v1444_v13  ;;  %v1154_v59 = vadd.f32 %v1153_v56, %v1152_v44  ;;  %v1424_v13 = vsel %vm712_vm10, 1.0, %v1578_v17 }
  0x1b   : > { %930 = vperm.xlu1 %1485, %v1718_v40   ;;  %933 = vperm.xlu0 %1484, %v1724_v41   ;;  %v1163_v24 = vsel %vm1074_vm2, %v1424_v13, 0.0 }
  0x1c   : > { %v1156_v63 = vadd.f32 %v1155_v62, %v1154_v59 }
  0x1d   : > { %924 = vperm.xlu2 %1486, %v1734_v48  }
  0x1e   : > { %v1158_v2 = vadd.f32 %v1157_v61, %v1156_v63 }
  0x23   : > { %945 = vperm.xlu0 %1484, %v1739_v52   ;;  %939 = vperm.xlu1 %1485, %v1742_v53  }
  0x24   : > { %1385 = vmatmul.msk.bf16.gmra.mxu0 %vm463_vm0, %v1435_v3  ;;  %1390 = vmatmul.msk.bf16.gmra.mxu3 %vm463_vm0, %v1440_v7 }
  0x25   : > { %927 = vperm.xlu2 %1486, %v1756_v57  }
  0x2b   : > { %951 = vperm.xlu0 %1484, %v1766_v0   ;;  %942 = vperm.xlu1 %1485, %v1769_v1  }
  0x2d   : > { %936 = vperm.xlu2 %1486, %v1794_v14  }
  0x33   : > { %948 = vperm.xlu1 %1485, %v1783_v10  }
  0x34   : > { %1386 = vmatmul.msk.bf16.gmra.mxu0 %vm463_vm0, %v1436_v4  ;;  %1391 = vmatmul.msk.bf16.gmra.mxu3 %vm463_vm0, %v1441_v9  ;;  %v1780_v9 = vld [vmem:[%s1683_s12 + $0x78] sm:$0xff] }
  0x35   : > { %960 = vperm.xlu0 %1484, %v1780_v9  }
  0x44   : > { %1387 = vmatmul.msk.bf16.gmra.mxu0 %vm463_vm0, %v1437_v6  ;;  %v1422_v6 = vsel %vm710_vm9, 1.0, %v1578_v17 }
  0x45   : > { %v1159_v11 = vsel %vm1074_vm2, %v1422_v6, 0.0 }
  0x54   : > { %1388 = vmatmul.msk.bf16.gmra.mxu0 %vm463_vm0, %v1438_v8 }
  0x85   : > { %v916_v6 = vpop.permute.xlu0 %915 }
  0x91   : > { %v497_v16 = vpop.f32.mrf.mxu0 }
  0x92   : > { %v498_v25 = vadd.f32 %v1699_v20, %v497_v16  ;;  %v1160_v16 = vadd.f32 %v1159_v11, %v1158_v2 }
  0x94   : > { %v537_v28 = vmax.f32 %v498_v25, 0.0  ;;  %v1161_v25 = vsel %vm1074_vm2, %v1423_v23, 0.0 }
  0x97   : > { %v522_v21 = vpop.f32.mrf.mxu3 }
  0x98   : > { %v523_v43 = vadd.f32 %v1699_v20, %v522_v21  ;;  %v919_v21 = vpop.permute.xlu1 %918 }
  0x99   : > { %v499_v26 = vpop.f32.mrf.mxu0 }
  0x9a   : > { %v500_v27 = vadd.f32 %v1699_v20, %v499_v26  ;;  %v1162_v26 = vadd.f32 %v1161_v25, %v1160_v16 }
  0x9c   : > { %v538_v29 = vmax.f32 %v500_v27, 0.0  ;;  %v1808_v27 = vld [vmem:[%s1683_s12 + $0x70] sm:$0xff] }
  0x9d   : > { %957 = vperm.xlu1 %1485, %v1808_v27  }
  0x9e   : > { %v553_v30 = vpack.c.bf16 %v538_v29, %v537_v28  ;;  %v1165_v28 = vsel %vm1074_vm2, %v1425_v22, 0.0  ;;  %v1164_v29 = vadd.f32 %v1163_v24, %v1162_v26 }
  0xa0   : > { %1408 = vmatmul.msk.bf16.vlgmr.msra.gmra.mxu1 %vm597_vm4, %v553_v30  ;;  %v1812_v30 = vld [vmem:[%s1683_s12 + $0x68] sm:$0xff] }
  0xa1   : > { %v502_v31 = vpop.f32.mrf.mxu0  ;;  %954 = vperm.xlu2 %1486, %v1812_v30  }
  0xa2   : > { %v503_v32 = vadd.f32 %v1699_v20, %v502_v31 }
  0xa4   : > { %v539_v35 = vmax.f32 %v503_v32, 0.0  ;;  %v1816_v32 = vadd.f32 %v1165_v28, %v1164_v29 }
  0xa9   : > { %v504_v33 = vpop.f32.mrf.mxu0 }
  0xaa   : > { %v505_v34 = vadd.f32 %v1699_v20, %v504_v33 }
  0xac   : > { %v540_v36 = vmax.f32 %v505_v34, 0.0 }
  0xae   : > { %v554_v37 = vpack.c.bf16 %v540_v36, %v539_v35  ;;  %v524_v35 = vpop.f32.mrf.mxu3 }
  0xaf   : > { %v525_v44 = vadd.f32 %v1699_v20, %v524_v35 }
  0xb0   : > { %1409 = vmatmul.msk.bf16.gmra.mxu1 %vm597_vm4, %v554_v37 }
  0xb1   : > { %v507_v38 = vpop.f32.mrf.mxu0 }
  0xb2   : > { %v508_v45 = vadd.f32 %v1699_v20, %v507_v38 }
  0xb4   : > { %v541_v49 = vmax.f32 %v508_v45, 0.0  ;;  %v547_v45 = vmax.f32 %v523_v43, 0.0 }
  0xb6   : > { %v527_v42 = vpop.f32.mrf.mxu3 }
  0xb9   : > { %v509_v46 = vpop.f32.mrf.mxu0 }
  0xba   : > { %v510_v47 = vadd.f32 %v1699_v20, %v509_v46  ;;  %v548_v46 = vmax.f32 %v525_v44, 0.0 }
  0xbc   : > { %v542_v50 = vmax.f32 %v510_v47, 0.0  ;;  %v558_v47 = vpack.c.bf16 %v548_v46, %v547_v45 }
  0xbe   : > { %v555_v51 = vpack.c.bf16 %v542_v50, %v541_v49  ;;  %v529_v49 = vpop.f32.mrf.mxu3  ;;  %v528_v50 = vadd.f32 %v1699_v20, %v527_v42 }
  0xc0   : > { %1410 = vmatmul.msk.bf16.gmra.mxu1 %vm597_vm4, %v555_v51  ;;  %v530_v51 = vadd.f32 %v1699_v20, %v529_v49  ;;  %v549_v55 = vmax.f32 %v528_v50, 0.0 }
  0xc1   : > { %v512_v58 = vpop.f32.mrf.mxu0 }
  0xc2   : > { %v513_v3 = vadd.f32 %v1699_v20, %v512_v58  ;;  %v550_v56 = vmax.f32 %v530_v51, 0.0 }
  0xc4   : > { %v543_v7 = vmax.f32 %v513_v3, 0.0  ;;  %v559_v58 = vpack.c.bf16 %v550_v56, %v549_v55  ;;  %v912_v3 = vlaneseq }
  0xc6   : > { %v532_v54 = vpop.f32.mrf.mxu3 }
  0xc7   : > { %v533_v60 = vadd.f32 %v1699_v20, %v532_v54 }
  0xc9   : > { %v514_v4 = vpop.f32.mrf.mxu0  ;;  %v551_v62 = vmax.f32 %v533_v60, 0.0 }
  0xca   : > { %v515_v5 = vadd.f32 %v1699_v20, %v514_v4  ;;  %v1830_v4 = vand.u32 127, %v912_v3 }
  0xcc   : > { %v544_v8 = vmax.f32 %v515_v5, 0.0  ;;  %v1835_v5 = vld [vmem:[%s2272_s4] ss:$0 sm:$0xff]  ;;  %vm962_vm14 = vcmp.eq.s32.totalorder %v1830_v4, %v916_v6  ;;  %vm963_vm15 = vcmp.eq.s32.totalorder %v1830_v4, %v919_v21  ;;  %v931_v6 = vpop.permute.xlu1 %930 }
  0xce   : > { %v556_v12 = vpack.c.bf16 %v544_v8, %v543_v7  ;;  %v534_v59 = vpop.f32.mrf.mxu3 }
  0xcf   : > { %v535_v61 = vadd.f32 %v1699_v20, %v534_v59 }
  0xd0   : > { %1411 = vmatmul.msk.bf16.gmra.mxu1 %vm597_vm4, %v556_v12 }
  0xd1   : > { %v517_v18 = vpop.f32.mrf.mxu0  ;;  %v552_v63 = vmax.f32 %v535_v61, 0.0 }
  0xd2   : > { %v518_v31 = vadd.f32 %v1699_v20, %v517_v18  ;;  %v922_v18 = vpop.permute.xlu2 %921 }
  0xd3   : > { %v560_v2 = vpack.c.bf16 %v552_v63, %v551_v62  ;;  %vm964_vm0 = vcmp.eq.s32.totalorder %v1830_v4, %v922_v18 }
  0xd4   : > { %v545_v36 = vmax.f32 %v518_v31, 0.0 }
  0xd9   : > { %v519_v33 = vpop.f32.mrf.mxu0 }
  0xda   : > { %v520_v34 = vadd.f32 %v1699_v20, %v519_v33  ;;  %v925_v29 = vpop.permute.xlu2 %924 }
  0xdc   : > { %v546_v37 = vmax.f32 %v520_v34, 0.0 }
  0xde   : > { %v557_v38 = vpack.c.bf16 %v546_v37, %v545_v36 }
  0xe0   : > { %1412 = vmatmul.msk.bf16.vlgmr.msra.gmra.mxu2 %vm597_vm4, %v557_v38 }
  0xe2   : > { %v928_v38 = vpop.permute.xlu2 %927 }
  0xf0   : > { %1413 = vmatmul.msk.bf16.gmra.mxu2 %vm597_vm4, %v558_v47 }
 0x100   : > { %1414 = vmatmul.msk.bf16.gmra.mxu2 %vm597_vm4, %v559_v58 }
 0x110   : > { %1415 = vmatmul.msk.bf16.gmra.mxu2 %vm597_vm4, %v560_v2  ;;  %vm965_vm4 = vcmp.eq.s32.totalorder %v1830_v4, %v925_v29 }
 0x11d   : > { %v631_v20 = vpop.f32.mrf.mxu1 }
 0x11e   : > { %v1846_v7 = vadd.f32 %v1835_v5, %v631_v20  ;;  %v934_v20 = vpop.permute.xlu0 %933 }
 0x120   : > { %672 = vst.msk [vmem:[%s1842_s19] sm:$0xff] %vm671_vm13, %v1846_v7  ;;  %v720_v8 = vsel %vm671_vm13, %v1846_v7, -inf  ;;  %v978_v11 = vsel %vm962_vm14, %v1846_v7, 0.0  ;;  %vm966_vm14 = vcmp.eq.s32.totalorder %v1830_v4, %v928_v38 }
 0x121   : > { %721 = vmax.xlane.f32.xlu0 %v720_v8  ;;  %v994_v12 = vsel %vm671_vm13, %v978_v11, 0.0 }
 0x122   : > { %995 = vadd.xlane.f32.xlu1 %v994_v12 }
 0x125   : > { %v633_v13 = vpop.f32.mrf.mxu1 }
 0x126   : > { %v1856_v16 = vadd.f32 %v1835_v5, %v633_v13  ;;  %v940_v13 = vpop.permute.xlu1 %939  ;;  %v1947_v21 = vpop.permute.xlu0 %945 }
 0x128   : > { %673 = vst.msk [vmem:[%s1842_s19 + $0x8] sm:$0xff] %vm671_vm13, %v1856_v16  ;;  %v723_v22 = vsel %vm671_vm13, %v1856_v16, -inf  ;;  %v979_v24 = vsel %vm963_vm15, %v1856_v16, 0.0  ;;  %vm968_vm15 = vcmp.eq.s32.totalorder %v1830_v4, %v934_v20 }
 0x129   : > { %724 = vmax.xlane.f32.xlu0 %v723_v22  ;;  %v997_v28 = vsel %vm671_vm13, %v979_v24, 0.0 }
 0x12d   : > { %v636_v23 = vpop.f32.mrf.mxu1 }
 0x12e   : > { %v1866_v25 = vadd.f32 %v1835_v5, %v636_v23 }
 0x130   : > { %674 = vst.msk [vmem:[%s1842_s19 + $0x10] sm:$0xff] %vm671_vm13, %v1866_v25  ;;  %v726_v26 = vsel %vm671_vm13, %v1866_v25, -inf  ;;  %v980_v33 = vsel %vm964_vm0, %v1866_v25, 0.0  ;;  %vm967_vm0 = vcmp.eq.s32.totalorder %v1830_v4, %v931_v6  ;;  %v937_v6 = vpop.permute.xlu2 %936 }
 0x131   : > { %727 = vmax.xlane.f32.xlu1 %v726_v26  ;;  %998 = vadd.xlane.f32.xlu0 %v997_v28  ;;  %v1000_v35 = vsel %vm671_vm13, %v980_v33, 0.0  ;;  %v943_v26 = vpop.permute.xlu1 %942  ;;  %v1957_v28 = vpop.permute.xlu0 %951 }
 0x135   : > { %v638_v31 = vpop.f32.mrf.mxu1 }
 0x136   : > { %v1878_v34 = vadd.f32 %v1835_v5, %v638_v31 }
 0x138   : > { %675 = vst.msk [vmem:[%s1842_s19 + $0x18] sm:$0xff] %vm671_vm13, %v1878_v34  ;;  %v981_v36 = vsel %vm965_vm4, %v1878_v34, 0.0  ;;  %v729_v44 = vsel %vm671_vm13, %v1878_v34, -inf  ;;  %vm971_vm4 = vcmp.eq.s32.totalorder %v1830_v4, %v943_v26 }
 0x139   : > { %1001 = vadd.xlane.f32.xlu1 %v1000_v35  ;;  %v1003_v37 = vsel %vm671_vm13, %v981_v36, 0.0  ;;  %v1968_v35 = vpop.permute.xlu1 %948  ;;  %v1971_v38 = vpop.permute.xlu0 %960 }
 0x13a   : > { %1004 = vadd.xlane.f32.xlu2 %v1003_v37 }
 0x13d   : > { %v641_v42 = vpop.f32.mrf.mxu1 }
 0x13e   : > { %v1888_v43 = vadd.f32 %v1835_v5, %v641_v42 }
 0x140   : > { %676 = vst.msk [vmem:[%s1842_s19 + $0x20] sm:$0xff] %vm671_vm13, %v1888_v43  ;;  %v732_v45 = vsel %vm671_vm13, %v1888_v43, -inf  ;;  %v982_v46 = vsel %vm966_vm14, %v1888_v43, 0.0  ;;  %vm970_vm14 = vcmp.eq.s32.totalorder %v1830_v4, %v940_v13 }
 0x141   : > { %730 = vmax.xlane.f32.xlu1 %v729_v44  ;;  %v1006_v47 = vsel %vm671_vm13, %v982_v46, 0.0 }
 0x142   : > { %733 = vmax.xlane.f32.xlu2 %v732_v45  ;;  %1007 = vadd.xlane.f32.xlu0 %v1006_v47 }
 0x145   : > { %v643_v49 = vpop.f32.mrf.mxu1 }
 0x146   : > { %v1900_v50 = vadd.f32 %v1835_v5, %v643_v49 }
 0x148   : > { %677 = vst.msk [vmem:[%s1842_s19 + $0x28] sm:$0xff] %vm671_vm13, %v1900_v50  ;;  %v735_v51 = vsel %vm671_vm13, %v1900_v50, -inf  ;;  %v983_v49 = vsel %vm967_vm0, %v1900_v50, 0.0  ;;  %vm973_vm0 = vcmp.eq.s32.totalorder %v1830_v4, %v1968_v35 }
 0x14a   : > { %736 = vmax.xlane.f32.xlu2 %v735_v51  ;;  %v1986_v51 = vpop.permute.xlu1 %957 }
 0x14d   : > { %v646_v54 = vpop.f32.mrf.mxu1 }
 0x14e   : > { %v1908_v55 = vadd.f32 %v1835_v5, %v646_v54 }
 0x150   : > { %678 = vst.msk [vmem:[%s1842_s19 + $0x30] sm:$0xff] %vm671_vm13, %v1908_v55  ;;  %v738_v56 = vsel %vm671_vm13, %v1908_v55, -inf  ;;  %v984_v37 = vsel %vm968_vm15, %v1908_v55, 0.0  ;;  %vm969_vm15 = vcmp.eq.s32.totalorder %v1830_v4, %v937_v6 }
 0x151   : > { %739 = vmax.xlane.f32.xlu0 %v738_v56  ;;  %v1012_v44 = vsel %vm671_vm13, %v984_v37, 0.0  ;;  %v2024_v37 = vpop.permute.xlu2 %954 }
 0x155   : > { %v648_v58 = vpop.f32.mrf.mxu1 }
 0x156   : > { %v1916_v59 = vadd.f32 %v1835_v5, %v648_v58 }
 0x158   : > { %679 = vst.msk [vmem:[%s1842_s19 + $0x38] sm:$0xff] %vm671_vm13, %v1916_v59  ;;  %v741_v60 = vsel %vm671_vm13, %v1916_v59, -inf }
 0x159   : > { %742 = vmax.xlane.f32.xlu1 %v741_v60 }
 0x163   : > { %v651_v61 = vpop.f32.mrf.mxu2 }
 0x164   : > { %v1924_v62 = vadd.f32 %v1835_v5, %v651_v61  ;;  %v1009_v61 = vsel %vm671_vm13, %v983_v49, 0.0 }
 0x166   : > { %680 = vst.msk [vmem:[%s1842_s19 + $0x40] sm:$0xff] %vm671_vm13, %v1924_v62  ;;  %v744_v63 = vsel %vm671_vm13, %v1924_v62, -inf  ;;  %v986_v20 = vsel %vm970_vm14, %v1924_v62, 0.0  ;;  %vm972_vm14 = vcmp.eq.s32.totalorder %v1830_v4, %v1947_v21 }
 0x167   : > { %745 = vmax.xlane.f32.xlu2 %v744_v63  ;;  %v1018_v26 = vsel %vm671_vm13, %v986_v20, 0.0 }
 0x16b   : > { %v653_v2 = vpop.f32.mrf.mxu2 }
 0x16c   : > { %v1932_v3 = vadd.f32 %v1835_v5, %v653_v2 }
 0x16e   : > { %681 = vst.msk [vmem:[%s1842_s19 + $0x48] sm:$0xff] %vm671_vm13, %v1932_v3  ;;  %v747_v8 = vsel %vm671_vm13, %v1932_v3, -inf  ;;  %v987_v47 = vsel %vm971_vm4, %v1932_v3, 0.0  ;;  %vm976_vm4 = vcmp.eq.s32.totalorder %v1830_v4, %v1986_v51 }
 0x16f   : > { %748 = vmax.xlane.f32.xlu0 %v747_v8  ;;  %v1021_v60 = vsel %vm671_vm13, %v987_v47, 0.0 }
 0x173   : > { %v656_v11 = vpop.f32.mrf.mxu2 }
 0x174   : > { %v1940_v12 = vadd.f32 %v1835_v5, %v656_v11 }
 0x176   : > { %682 = vst.msk [vmem:[%s1842_s19 + $0x50] sm:$0xff] %vm671_vm13, %v1940_v12  ;;  %v750_v18 = vsel %vm671_vm13, %v1940_v12, -inf }
 0x177   : > { %751 = vmax.xlane.f32.xlu1 %v750_v18 }
 0x17b   : > { %v658_v22 = vpop.f32.mrf.mxu2 }
 0x17c   : > { %v1950_v23 = vadd.f32 %v1835_v5, %v658_v22  ;;  %v985_v22 = vsel %vm969_vm15, %v1916_v59, 0.0  ;;  %vm974_vm15 = vcmp.eq.s32.totalorder %v1830_v4, %v1957_v28 }
 0x17e   : > { %683 = vst.msk [vmem:[%s1842_s19 + $0x58] sm:$0xff] %vm671_vm13, %v1950_v23  ;;  %v753_v24 = vsel %vm671_vm13, %v1950_v23, -inf }
 0x17f   : > { %754 = vmax.xlane.f32.xlu2 %v753_v24 }
 0x183   : > { %v661_v29 = vpop.f32.mrf.mxu2 }
 0x184   : > { %v1960_v31 = vadd.f32 %v1835_v5, %v661_v29 }
 0x186   : > { %684 = vst.msk [vmem:[%s1842_s19 + $0x60] sm:$0xff] %vm671_vm13, %v1960_v31  ;;  %v756_v33 = vsel %vm671_vm13, %v1960_v31, -inf }
 0x187   : > { %757 = vmax.xlane.f32.xlu2 %v756_v33 }
 0x18b   : > { %v663_v36 = vpop.f32.mrf.mxu2 }
 0x18c   : > { %v1974_v42 = vadd.f32 %v1835_v5, %v663_v36 }
 0x18e   : > { %685 = vst.msk [vmem:[%s1842_s19 + $0x68] sm:$0xff] %vm671_vm13, %v1974_v42  ;;  %v759_v45 = vsel %vm671_vm13, %v1974_v42, -inf }
 0x18f   : > { %1013 = vadd.xlane.f32.xlu2 %v1012_v44  ;;  %760 = vmax.xlane.f32.xlu1 %v759_v45 }
 0x193   : > { %v666_v46 = vpop.f32.mrf.mxu2 }
 0x194   : > { %v1989_v54 = vadd.f32 %v1835_v5, %v666_v46  ;;  %v1991_v56 = vpop.xlane.xlu0 %721 }
 0x195   : > { %v768_v58 = vsub.f32 %v1846_v7, %v1991_v56  ;;  %v2005_v8 = vpop.xlane.xlu1 %995 }
 0x196   : > { %686 = vst.msk [vmem:[%s1842_s19 + $0x70] sm:$0xff] %vm671_vm13, %v1989_v54  ;;  %v762_v63 = vsel %vm671_vm13, %v1989_v54, -inf }
 0x197   : > { %1022 = vadd.xlane.f32.xlu2 %v1021_v60  ;;  %1010 = vadd.xlane.f32.xlu1 %v1009_v61  ;;  %v784_v2 = vmul.f32 1.442695, %v768_v58 }
 0x198   : > { %763 = vmax.xlane.f32.xlu0 %v762_v63 }
 0x199   : > { %1489 = vpow2.f32 %v784_v2 }
 0x19b   : > { %v668_v7 = vpop.f32.mrf.mxu2 }
 0x19c   : > { %v2008_v11 = vadd.f32 %v1835_v5, %v668_v7  ;;  %v2010_v18 = vpop.xlane.xlu0 %724  ;;  %v1015_v5 = vsel %vm671_vm13, %v985_v22, 0.0 }
 0x19d   : > { %v769_v13 = vsub.f32 %v1856_v16, %v2010_v18 }
 0x19e   : > { %687 = vst.msk [vmem:[%s1842_s19 + $0x78] sm:$0xff] %vm671_vm13, %v2008_v11  ;;  %v765_v24 = vsel %vm671_vm13, %v2008_v11, -inf }
 0x19f   : > { %v786_v29 = vmul.f32 1.442695, %v769_v13  ;;  %766 = vmax.xlane.f32.xlu2 %v765_v24  ;;  %1019 = vadd.xlane.f32.xlu1 %v1018_v26  ;;  %v1490_v33 = vpop.eup %1489 }
 0x1a0   : > { %1016 = vadd.xlane.f32.xlu0 %v1015_v5  ;;  %v816_v44 = vsel %vm671_vm13, %v1490_v33, 0.0 }
 0x1a1   : > { %1491 = vpow2.f32 %v786_v29 }
 0x1a4   : > { %v2022_v36 = vpop.xlane.xlu1 %727  ;;  %v2035_v63 = vpop.xlane.xlu0 %998 }
 0x1a5   : > { %v770_v16 = vsub.f32 %v1866_v25, %v2022_v36 }
 0x1a7   : > { %v1492_v45 = vpop.eup %1491  ;;  %v788_v46 = vmul.f32 1.442695, %v770_v16  ;;  %817 = vadd.xlane.f32.xlu2 %v816_v44 }
 0x1a8   : > { %v819_v47 = vsel %vm671_vm13, %v1492_v45, 0.0 }
 0x1a9   : > { %1493 = vpow2.f32 %v788_v46  ;;  %820 = vadd.xlane.f32.xlu1 %v819_v47 }
 0x1ac   : > { %v2030_v49 = vpop.xlane.xlu1 %1001 }
 0x1ad   : > { %v2032_v58 = vpop.xlane.xlu2 %1004 }
 0x1af   : > { %v1494_v60 = vpop.eup %1493 }
 0x1b0   : > { %v822_v61 = vsel %vm671_vm13, %v1494_v60, 0.0 }
 0x1b1   : > { %823 = vadd.xlane.f32.xlu0 %v822_v61 }
 0x1b4   : > { %v2037_v25 = vpop.xlane.xlu1 %730 }
 0x1b5   : > { %v771_v2 = vsub.f32 %v1878_v34, %v2037_v25  ;;  %v2041_v6 = vpop.xlane.xlu2 %733  ;;  %v2045_v13 = vpop.xlane.xlu0 %1007 }
 0x1b6   : > { %v772_v7 = vsub.f32 %v1888_v43, %v2041_v6 }
 0x1b7   : > { %v790_v20 = vmul.f32 1.442695, %v771_v2 }
 0x1b8   : > { %v792_v22 = vmul.f32 1.442695, %v772_v7 }
 0x1b9   : > { %1495 = vpow2.f32 %v790_v20 }
 0x1ba   : > { %1497 = vpow2.f32 %v792_v22 }
 0x1bd   : > { %v2047_v24 = vpop.xlane.xlu2 %736 }
 0x1be   : > { %v773_v26 = vsub.f32 %v1900_v50, %v2047_v24 }
 0x1bf   : > { %v1496_v29 = vpop.eup %1495 }
 0x1c0   : > { %v1498_v5 = vpop.eup %1497  ;;  %v794_v33 = vmul.f32 1.442695, %v773_v26  ;;  %v825_v34 = vsel %vm671_vm13, %v1496_v29, 0.0 }
 0x1c1   : > { %826 = vadd.xlane.f32.xlu2 %v825_v34  ;;  %v828_v16 = vsel %vm671_vm13, %v1498_v5, 0.0 }
 0x1c2   : > { %1499 = vpow2.f32 %v794_v33  ;;  %829 = vadd.xlane.f32.xlu1 %v828_v16 }
 0x1c4   : > { %v2053_v43 = vpop.xlane.xlu0 %739 }
 0x1c5   : > { %v774_v44 = vsub.f32 %v1908_v55, %v2053_v43 }
 0x1c7   : > { %v796_v45 = vmul.f32 1.442695, %v774_v44 }
 0x1c8   : > { %v1500_v46 = vpop.eup %1499 }
 0x1c9   : > { %1501 = vpow2.f32 %v796_v45  ;;  %v831_v50 = vsel %vm671_vm13, %v1500_v46, 0.0 }
 0x1ca   : > { %832 = vadd.xlane.f32.xlu0 %v831_v50 }
 0x1cc   : > { %v2058_v47 = vpop.xlane.xlu1 %742 }
 0x1cd   : > { %v775_v60 = vsub.f32 %v1916_v59, %v2058_v47 }
 0x1cf   : > { %v1502_v61 = vpop.eup %1501  ;;  %v798_v2 = vmul.f32 1.442695, %v775_v60 }
 0x1d0   : > { %v834_v7 = vsel %vm671_vm13, %v1502_v61, 0.0 }
 0x1d1   : > { %1503 = vpow2.f32 %v798_v2  ;;  %835 = vadd.xlane.f32.xlu2 %v834_v7 }
 0x1d7   : > { %v1504_v20 = vpop.eup %1503 }
 0x1d8   : > { %v837_v55 = vsel %vm671_vm13, %v1504_v20, 0.0 }
 0x1d9   : > { %838 = vadd.xlane.f32.xlu2 %v837_v55 }
 0x1da   : > { %v2064_v22 = vpop.xlane.xlu2 %745 }
 0x1db   : > { %v776_v26 = vsub.f32 %v1924_v62, %v2064_v22 }
 0x1dd   : > { %v800_v29 = vmul.f32 1.442695, %v776_v26 }
 0x1df   : > { %1505 = vpow2.f32 %v800_v29 }
 0x1e2   : > { %v2068_v5 = vpop.xlane.xlu0 %748 }
 0x1e3   : > { %v777_v59 = vsub.f32 %v1932_v3, %v2068_v5 }
 0x1e5   : > { %v1506_v33 = vpop.eup %1505  ;;  %v802_v34 = vmul.f32 1.442695, %v777_v59 }
 0x1e6   : > { %v840_v16 = vsel %vm671_vm13, %v1506_v33, 0.0 }
 0x1e7   : > { %1507 = vpow2.f32 %v802_v34  ;;  %841 = vadd.xlane.f32.xlu0 %v840_v16 }
 0x1ea   : > { %v2073_v44 = vpop.xlane.xlu1 %751 }
 0x1eb   : > { %v778_v45 = vsub.f32 %v1940_v12, %v2073_v44 }
 0x1ed   : > { %v1508_v46 = vpop.eup %1507  ;;  %v804_v62 = vmul.f32 1.442695, %v778_v45 }
 0x1ee   : > { %v843_v50 = vsel %vm671_vm13, %v1508_v46, 0.0 }
 0x1ef   : > { %1509 = vpow2.f32 %v804_v62  ;;  %844 = vadd.xlane.f32.xlu1 %v843_v50 }
 0x1f2   : > { %v2078_v60 = vpop.xlane.xlu2 %754 }
 0x1f3   : > { %v779_v3 = vsub.f32 %v1950_v23, %v2078_v60 }
 0x1f5   : > { %v1510_v61 = vpop.eup %1509  ;;  %v806_v2 = vmul.f32 1.442695, %v779_v3 }
 0x1f6   : > { %v846_v7 = vsel %vm671_vm13, %v1510_v61, 0.0 }
 0x1f7   : > { %1511 = vpow2.f32 %v806_v2  ;;  %847 = vadd.xlane.f32.xlu2 %v846_v7 }
 0x1fa   : > { %v2083_v20 = vpop.xlane.xlu2 %757 }
 0x1fb   : > { %v780_v55 = vsub.f32 %v1960_v31, %v2083_v20 }
 0x1fd   : > { %v1512_v26 = vpop.eup %1511  ;;  %v808_v29 = vmul.f32 1.442695, %v780_v55 }
 0x1fe   : > { %v849_v59 = vsel %vm671_vm13, %v1512_v26, 0.0 }
 0x1ff   : > { %1513 = vpow2.f32 %v808_v29  ;;  %850 = vadd.xlane.f32.xlu0 %v849_v59 }
 0x202   : > { %v2088_v33 = vpop.xlane.xlu2 %1013  ;;  %v2090_v34 = vpop.xlane.xlu1 %760 }
 0x203   : > { %v781_v16 = vsub.f32 %v1974_v42, %v2090_v34 }
 0x205   : > { %v1514_v45 = vpop.eup %1513  ;;  %v810_v46 = vmul.f32 1.442695, %v781_v16  ;;  %v989_v16 = vsel %vm973_vm0, %v1950_v23, 0.0  ;;  %v992_v23 = vsel %vm976_vm4, %v1989_v54, 0.0  ;;  %vm975_vm0 = vcmp.eq.s32.totalorder %v1830_v4, %v2024_v37 }
 0x206   : > { %v852_v62 = vsel %vm671_vm13, %v1514_v45, 0.0  ;;  %vm977_vm4 = vcmp.eq.s32.totalorder %v1830_v4, %v1971_v38 }
 0x207   : > { %1515 = vpow2.f32 %v810_v46  ;;  %853 = vadd.xlane.f32.xlu1 %v852_v62 }
 0x20a   : > { %v2095_v50 = vpop.xlane.xlu2 %1022  ;;  %v2097_v3 = vpop.xlane.xlu1 %1010 }
 0x20b   : > { %v2099_v61 = vpop.xlane.xlu0 %763 }
 0x20c   : > { %v782_v2 = vsub.f32 %v1989_v54, %v2099_v61 }
 0x20d   : > { %v1516_v7 = vpop.eup %1515 }
 0x20e   : > { %v812_v55 = vmul.f32 1.442695, %v782_v2  ;;  %v855_v26 = vsel %vm671_vm13, %v1516_v7, 0.0  ;;  %v1027_v2 = vsel %vm671_vm13, %v989_v16, 0.0 }
 0x20f   : > { %856 = vadd.xlane.f32.xlu2 %v855_v26 }
 0x210   : > { %1517 = vpow2.f32 %v812_v55 }
 0x212   : > { %v2106_v29 = vpop.xlane.xlu2 %766  ;;  %v2111_v45 = vpop.xlane.xlu1 %1019 }
 0x213   : > { %v783_v59 = vsub.f32 %v2008_v11, %v2106_v29  ;;  %v2120_v55 = vpop.xlane.xlu0 %1016 }
 0x215   : > { %v814_v46 = vmul.f32 1.442695, %v783_v59  ;;  %v988_v59 = vsel %vm972_vm14, %v1940_v12, 0.0  ;;  %v990_v12 = vsel %vm974_vm15, %v1960_v31, 0.0 }
 0x216   : > { %v1518_v62 = vpop.eup %1517  ;;  %v1024_v51 = vsel %vm671_vm13, %v988_v59, 0.0  ;;  %v1030_v28 = vsel %vm671_vm13, %v990_v12, 0.0 }
 0x217   : > { %1519 = vpow2.f32 %v814_v46  ;;  %1028 = vadd.xlane.f32.xlu2 %v1027_v2  ;;  %v858_v7 = vsel %vm671_vm13, %v1518_v62, 0.0  ;;  %v1036_v46 = vsel %vm671_vm13, %v992_v23, 0.0 }
 0x218   : > { %859 = vadd.xlane.f32.xlu0 %v858_v7 }
 0x21a   : > { %v818_v35 = vpop.xlane.xlu2 %817 }
 0x21b   : > { %1521 = vlog2.f32 %v818_v35 }
 0x21c   : > { %v821_v26 = vpop.xlane.xlu1 %820 }
 0x21d   : > { %v1520_v16 = vpop.eup %1519  ;;  %1523 = vlog2.f32 %v821_v26  ;;  %v991_v26 = vsel %vm975_vm0, %v1974_v42, 0.0 }
 0x21e   : > { %v861_v62 = vsel %vm671_vm13, %v1520_v16, 0.0 }
 0x21f   : > { %1037 = vadd.xlane.f32.xlu2 %v1036_v46  ;;  %862 = vadd.xlane.f32.xlu1 %v861_v62  ;;  %v1033_v46 = vsel %vm671_vm13, %v991_v26, 0.0  ;;  %v993_v62 = vsel %vm977_vm4, %v2008_v11, 0.0 }
 0x220   : > { %1025 = vadd.xlane.f32.xlu0 %v1024_v51 }
 0x221   : > { %v1522_v21 = vpop.eup %1521 }
 0x222   : > { %v865_v54 = vmul.f32 0.6931472, %v1522_v21 }
 0x223   : > { %v1524_v2 = vpop.eup %1523 }
 0x224   : > { %v896_v7 = vadd.f32 %v865_v54, %v1991_v56  ;;  %v867_v35 = vmul.f32 0.6931472, %v1524_v2  ;;  %v824_v23 = vpop.xlane.xlu0 %823 }
 0x225   : > { %1525 = vlog2.f32 %v824_v23 }
 0x226   : > { %v1042_v59 = vsub.f32 %v896_v7, %v2005_v8  ;;  %v897_v16 = vadd.f32 %v867_v35, %v2010_v18 }
 0x227   : > { %1031 = vadd.xlane.f32.xlu1 %v1030_v28 }
 0x228   : > { %v1058_v37 = vsel %vm704_vm1, %v1042_v59, 0.0  ;;  %v1043_v31 = vsub.f32 %v897_v16, %v2035_v63  ;;  %1034 = vadd.xlane.f32.xlu0 %v1033_v46  ;;  %v1039_v63 = vsel %vm671_vm13, %v993_v62, 0.0  ;;  %vm714_vm1 = vcmp.ge.s32.totalorder %v1739_v52, 0 }
 0x229   : > { %v1075_v8 = vsel %vm1074_vm2, %v1058_v37, 0.0  ;;  %v1426_v53 = vsel %vm714_vm1, 1.0, %v1578_v17 }
 0x22a   : > { %v1059_v42 = vsel %vm705_vm3, %v1043_v31, 0.0  ;;  %vm716_vm3 = vcmp.ge.s32.totalorder %v1766_v0, 0 }
 0x22b   : > { %v1526_v56 = vpop.eup %1525  ;;  %v1076_v18 = vsel %vm1074_vm2, %v1059_v42, 0.0  ;;  %v1428_v1 = vsel %vm716_vm3, 1.0, %v1578_v17 }
 0x22c   : > { %v1077_v51 = vadd.f32 %v1076_v18, %v1075_v8  ;;  %v869_v21 = vmul.f32 0.6931472, %v1526_v56 }
 0x22e   : > { %v898_v15 = vadd.f32 %v869_v21, %v2022_v36 }
 0x22f   : > { %1040 = vadd.xlane.f32.xlu1 %v1039_v63 }
 0x230   : > { %v1044_v54 = vsub.f32 %v898_v15, %v2030_v49 }
 0x232   : > { %v1060_v19 = vsel %vm706_vm5, %v1044_v54, 0.0  ;;  %vm715_vm5 = vcmp.ge.s32.totalorder %v1783_v10, 0 }
 0x233   : > { %v1078_v4 = vsel %vm1074_vm2, %v1060_v19, 0.0 }
 0x234   : > { %v1079_v38 = vadd.f32 %v1078_v4, %v1077_v51  ;;  %v827_v2 = vpop.xlane.xlu2 %826 }
 0x235   : > { %1527 = vlog2.f32 %v827_v2  ;;  %v830_v12 = vpop.xlane.xlu1 %829 }
 0x236   : > { %1529 = vlog2.f32 %v830_v12 }
 0x23b   : > { %v1528_v11 = vpop.eup %1527 }
 0x23c   : > { %v1530_v7 = vpop.eup %1529  ;;  %v871_v35 = vmul.f32 0.6931472, %v1528_v11 }
 0x23d   : > { %v873_v23 = vmul.f32 0.6931472, %v1530_v7  ;;  %v833_v36 = vpop.xlane.xlu0 %832 }
 0x23e   : > { %v899_v26 = vadd.f32 %v871_v35, %v2037_v25  ;;  %1531 = vlog2.f32 %v833_v36 }
 0x23f   : > { %v900_v49 = vadd.f32 %v873_v23, %v2041_v6 }
 0x240   : > { %v1045_v39 = vsub.f32 %v899_v26, %v2032_v58 }
 0x241   : > { %v1046_v59 = vsub.f32 %v900_v49, %v2045_v13 }
 0x242   : > { %v1061_v16 = vsel %vm707_vm6, %v1045_v39, 0.0  ;;  %vm717_vm6 = vcmp.ge.s32.totalorder %v1812_v30, 0 }
 0x243   : > { %v1080_v28 = vsel %vm1074_vm2, %v1061_v16, 0.0  ;;  %v1062_v46 = vsel %vm708_vm8, %v1046_v59, 0.0  ;;  %v1429_v16 = vsel %vm717_vm6, 1.0, %v1578_v17  ;;  %vm719_vm8 = vcmp.ge.s32.totalorder %v1780_v9, 0 }
 0x244   : > { %v1532_v37 = vpop.eup %1531  ;;  %v1081_v31 = vadd.f32 %v1080_v28, %v1079_v38  ;;  %v1082_v42 = vsel %vm1074_vm2, %v1062_v46, 0.0  ;;  %v836_v25 = vpop.xlane.xlu2 %835  ;;  %v1171_v46 = vsel %vm1074_vm2, %v1428_v1, 0.0 }
 0x245   : > { %v875_v56 = vmul.f32 0.6931472, %v1532_v37  ;;  %1533 = vlog2.f32 %v836_v25 }
 0x246   : > { %v1083_v6 = vadd.f32 %v1082_v42, %v1081_v31  ;;  %v1173_v31 = vsel %vm1074_vm2, %v1429_v16, 0.0 }
 0x247   : > { %v901_v58 = vadd.f32 %v875_v56, %v2047_v24 }
 0x249   : > { %v1047_v13 = vsub.f32 %v901_v58, %v2097_v3 }
 0x24b   : > { %v1534_v8 = vpop.eup %1533  ;;  %v1063_v48 = vsel %vm709_vm7, %v1047_v13, 0.0  ;;  %vm718_vm7 = vcmp.ge.s32.totalorder %v1808_v27, 0 }
 0x24c   : > { %v1084_v18 = vsel %vm1074_vm2, %v1063_v48, 0.0  ;;  %v877_v57 = vmul.f32 0.6931472, %v1534_v8  ;;  %v839_v62 = vpop.xlane.xlu2 %838  ;;  %v1430_v42 = vsel %vm718_vm7, 1.0, %v1578_v17 }
 0x24d   : > { %v1085_v51 = vadd.f32 %v1084_v18, %v1083_v6  ;;  %1535 = vlog2.f32 %v839_v62  ;;  %v1175_v58 = vsel %vm1074_vm2, %v1430_v42, 0.0 }
 0x24e   : > { %v902_v21 = vadd.f32 %v877_v57, %v2053_v43 }
 0x250   : > { %v1048_v15 = vsub.f32 %v902_v21, %v2088_v33 }
 0x252   : > { %v1064_v63 = vsel %vm710_vm9, %v1048_v15, 0.0  ;;  %vm384_vm9 = vcmask 0  }
 0x253   : > { %v1536_v24 = vpop.eup %1535  ;;  %v1086_v3 = vsel %vm1074_vm2, %v1064_v63, 0.0  ;;  %385 = vst.msk [vmem:[#allocation2] sm:$0x1] %vm384_vm9, %v1578_v17 }
 0x254   : > { %v1087_v54 = vadd.f32 %v1086_v3, %v1085_v51  ;;  %v879_v19 = vmul.f32 0.6931472, %v1536_v24  ;;  %386 = vst.msk [vmem:[#allocation3] sm:$0x1] %vm384_vm9, %v1578_v17 }
 0x256   : > { %v903_v40 = vadd.f32 %v879_v19, %v2058_v47 }
 0x258   : > { %v1049_v4 = vsub.f32 %v903_v40, %v2120_v55 }
 0x25a   : > { %v1065_v38 = vsel %vm711_vm12, %v1049_v4, 0.0  ;;  %v842_v2 = vpop.xlane.xlu0 %841 }
 0x25b   : > { %v1088_v43 = vsel %vm1074_vm2, %v1065_v38, 0.0  ;;  %1537 = vlog2.f32 %v842_v2 }
 0x25c   : > { %v1089_v33 = vadd.f32 %v1088_v43, %v1087_v54 }
 0x261   : > { %v1538_v12 = vpop.eup %1537 }
 0x262   : > { %v881_v41 = vmul.f32 0.6931472, %v1538_v12  ;;  %v845_v11 = vpop.xlane.xlu1 %844 }
 0x263   : > { %1539 = vlog2.f32 %v845_v11 }
 0x264   : > { %v904_v7 = vadd.f32 %v881_v41, %v2064_v22 }
 0x266   : > { %v1050_v35 = vsub.f32 %v904_v7, %v2111_v45 }
 0x268   : > { %v1066_v47 = vsel %vm712_vm10, %v1050_v35, 0.0 }
 0x269   : > { %v1540_v55 = vpop.eup %1539  ;;  %v1090_v14 = vsel %vm1074_vm2, %v1066_v47, 0.0 }
 0x26a   : > { %v883_v23 = vmul.f32 0.6931472, %v1540_v55  ;;  %v1091_v36 = vadd.f32 %v1090_v14, %v1089_v33  ;;  %v848_v56 = vpop.xlane.xlu2 %847 }
 0x26c   : > { %v905_v26 = vadd.f32 %v883_v23, %v2068_v5  ;;  %v1427_v5 = vsel %vm715_vm5, 1.0, %v1578_v17 }
 0x26d   : > { %v1169_v59 = vsel %vm1074_vm2, %v1427_v5, 0.0 }
 0x26e   : > { %v1051_v49 = vsub.f32 %v905_v26, %v2095_v50  ;;  %v1167_v50 = vsel %vm1074_vm2, %v1426_v53, 0.0 }
 0x26f   : > { %v1168_v28 = vadd.f32 %v1167_v50, %v1816_v32  ;;  %v1431_v32 = vsel %vm719_vm8, 1.0, %v1578_v17  ;;  %v1193_v17 = vld [vmem:[#allocation3] sm:$0x1] }
 0x270   : > { %v1067_v39 = vsel %vm713_vm11, %v1051_v49, 0.0  ;;  %v1177_v48 = vsel %vm1074_vm2, %v1431_v32, 0.0 }
 0x271   : > { %v1092_v22 = vsel %vm1074_vm2, %v1067_v39, 0.0  ;;  %v1170_v37 = vadd.f32 %v1169_v59, %v1168_v28 }
 0x272   : > { %v1093_v45 = vadd.f32 %v1092_v22, %v1091_v36  ;;  %v851_v13 = vpop.xlane.xlu0 %850 }
 0x273   : > { %v1172_v25 = vadd.f32 %v1171_v46, %v1170_v37  ;;  %1541 = vlog2.f32 %v851_v13 }
 0x274   : > { %1543 = vlog2.f32 %v848_v56 }
 0x275   : > { %v1174_v6 = vadd.f32 %v1173_v31, %v1172_v25 }
 0x277   : > { %v1176_v8 = vadd.f32 %v1175_v58, %v1174_v6 }
 0x279   : > { %v1178_v18 = vadd.f32 %v1177_v48, %v1176_v8  ;;  %v1542_v51 = vpop.eup %1541 }
 0x27a   : > { %v854_v62 = vpop.xlane.xlu1 %853  ;;  %v1544_v21 = vpop.eup %1543  ;;  %v887_v63 = vmul.f32 0.6931472, %v1542_v51 }
 0x27b   : > { %1179 = vadd.xlane.f32.xlu2 %v1178_v18  ;;  %1545 = vlog2.f32 %v854_v62  ;;  %v885_v24 = vmul.f32 0.6931472, %v1544_v21  ;;  %v1189_v21 = vld [vmem:[#allocation2] sm:$0x1] }
 0x27c   : > { %v907_v54 = vadd.f32 %v887_v63, %v2078_v60 }
 0x27d   : > { %v906_v2 = vadd.f32 %v885_v24, %v2073_v44 }
 0x281   : > { %v1546_v19 = vpop.eup %1545 }
 0x282   : > { %v857_v57 = vpop.xlane.xlu2 %856  ;;  %v889_v11 = vmul.f32 0.6931472, %v1546_v19 }
 0x284   : > { %v908_v23 = vadd.f32 %v889_v11, %v2083_v20 }
 0x28a   : > { %v1029_v3 = vpop.xlane.xlu2 %1028 }
 0x28b   : > { %v860_v15 = vpop.xlane.xlu0 %859  ;;  %v1053_v4 = vsub.f32 %v907_v54, %v1029_v3 }
 0x28c   : > { %1547 = vlog2.f32 %v860_v15 }
 0x28d   : > { %1549 = vlog2.f32 %v857_v57  ;;  %v1069_v35 = vsel %vm715_vm5, %v1053_v4, 0.0 }
 0x28e   : > { %v1096_v44 = vsel %vm1074_vm2, %v1069_v35, 0.0 }
 0x292   : > { %v1548_v40 = vpop.eup %1547  ;;  %v863_v38 = vpop.xlane.xlu1 %862 }
 0x293   : > { %v1550_v43 = vpop.eup %1549  ;;  %v893_v33 = vmul.f32 0.6931472, %v1548_v40  ;;  %v1026_v12 = vpop.xlane.xlu0 %1025  ;;  %1551 = vlog2.f32 %v863_v38 }
 0x294   : > { %v1052_v41 = vsub.f32 %v906_v2, %v1026_v12  ;;  %v891_v7 = vmul.f32 0.6931472, %v1550_v43  ;;  %v1038_v26 = vpop.xlane.xlu2 %1037 }
 0x295   : > { %v910_v60 = vadd.f32 %v893_v33, %v2099_v61 }
 0x296   : > { %v1068_v47 = vsel %vm714_vm1, %v1052_v41, 0.0  ;;  %v909_v22 = vadd.f32 %v891_v7, %v2090_v34 }
 0x297   : > { %v1094_v55 = vsel %vm1074_vm2, %v1068_v47, 0.0  ;;  %v1056_v10 = vsub.f32 %v910_v60, %v1038_v26 }
 0x298   : > { %v1095_v14 = vadd.f32 %v1094_v55, %v1093_v45 }
 0x299   : > { %v1552_v36 = vpop.eup %1551  ;;  %v1072_v20 = vsel %vm718_vm7, %v1056_v10, 0.0 }
 0x29a   : > { %v1032_v49 = vpop.xlane.xlu1 %1031  ;;  %v1097_v39 = vadd.f32 %v1096_v44, %v1095_v14  ;;  %v895_v50 = vmul.f32 0.6931472, %v1552_v36  ;;  %v1102_v46 = vsel %vm1074_vm2, %v1072_v20, 0.0 }
 0x29b   : > { %v1054_v53 = vsub.f32 %v908_v23, %v1032_v49  ;;  %v1035_v5 = vpop.xlane.xlu0 %1034 }
 0x29c   : > { %v1055_v52 = vsub.f32 %v909_v22, %v1035_v5  ;;  %v911_v28 = vadd.f32 %v895_v50, %v2106_v29 }
 0x29d   : > { %v1070_v61 = vsel %vm716_vm3, %v1054_v53, 0.0 }
 0x29e   : > { %v1098_v45 = vsel %vm1074_vm2, %v1070_v61, 0.0  ;;  %v1071_v1 = vsel %vm717_vm6, %v1055_v52, 0.0 }
 0x29f   : > { %v1099_v59 = vadd.f32 %v1098_v45, %v1097_v39  ;;  %v1100_v16 = vsel %vm1074_vm2, %v1071_v1, 0.0 }
 0x2a1   : > { %v1101_v34 = vadd.f32 %v1100_v16, %v1099_v59 }
 0x2a2   : > { %v1041_v37 = vpop.xlane.xlu1 %1040 }
 0x2a3   : > { %v1057_v31 = vsub.f32 %v911_v28, %v1041_v37  ;;  %v1103_v0 = vadd.f32 %v1102_v46, %v1101_v34 }
 0x2a5   : > { %v1073_v42 = vsel %vm719_vm8, %v1057_v31, 0.0 }
 0x2a6   : > { %v1104_v30 = vsel %vm1074_vm2, %v1073_v42, 0.0 }
 0x2a7   : > { %v1105_v25 = vadd.f32 %v1104_v30, %v1103_v0 }
 0x2a9   : > { %1106 = vadd.xlane.f32.xlu0 %v1105_v25 }
 0x2ee   : > { %v1180_v27 = vpop.xlane.xlu2 %1179 }
 0x2ef   : > { %v1181_v29 = vrot.slane %v1180_v27, 4 }
 0x2f1   : > { %v1182_v56 = vadd.f32 %v1181_v29, %v1180_v27 }
 0x2f3   : > { %v1183_v6 = vrot.slane %v1182_v56, 2 }
 0x2f5   : > { %v1184_v32 = vadd.f32 %v1183_v6, %v1182_v56 }
 0x2f7   : > { %v1185_v18 = vrot.slane %v1184_v32, 1 }
 0x2f9   : > { %v1186_v51 = vadd.f32 %v1185_v18, %v1184_v32 }
 0x31c   : > { %v1107_v58 = vpop.xlane.xlu0 %1106 }
 0x31d   : > { %v1108_v13 = vrot.slane %v1107_v58, 4 }
 0x31f   : > { %v1109_v9 = vadd.f32 %v1108_v13, %v1107_v58 }
 0x321   : > { %v1110_v8 = vrot.slane %v1109_v9, 2 }
 0x323   : > { %v1111_v48 = vadd.f32 %v1110_v8, %v1109_v9 }
 0x325   : > { %v1112_v57 = vrot.slane %v1111_v48, 1 }
 0x327   : > { %v1113_v62 = vadd.f32 %v1112_v57, %v1111_v48 }
 0x329   : > { %1454 = vpush %v1113_v62 }
 0x32a   : > { %1456 = vpush %v1186_v51 }
 0x35a   : > { %s1455_s11 = spop %1454 }
 0x35b   : > { %v1115_v15 = vstv %s1455_s11  ;;  %s1457_s20 = spop %1456 }
 0x35c   : > { %v1190_v63 = vadd.f32 %v1189_v21, %v1115_v15  ;;  %v1188_v24 = vstv %s1457_s20 }
 0x35d   : > { %v1194_v3 = vadd.f32 %v1193_v17, %v1188_v24 }
 0x35e   : > { %1192 = vst.msk [vmem:[#allocation2] sm:$0x1] %vm384_vm9, %v1190_v63 }
 0x35f   : > { %1195 = vst.msk [vmem:[#allocation3] sm:$0x1] %vm384_vm9, %v1194_v3 }
 0x365   : > { %v1199_v54 = vld [vmem:[#allocation2] sm:$0x1] }
 0x366   : > { %1200 = vst.msk [vmem:[%s375_s23] sm:$0x1] %vm384_vm9, %v1199_v54  ;;  %v1201_v19 = vld [vmem:[#allocation3] sm:$0x1] }
 0x367   : > { %1202 = vst.msk [vmem:[%s378_s26] sm:$0x1] %vm384_vm9, %v1201_v19 }
 0x368 PF: > { %s19_s29 = sadd.s32 1, %s1575_s29   ;;  %s2277_s27 = smov %s1571_s28 }
 0x369   : > { %p16_p6 = scmp.ge.s32.totalorder %s19_s29, 4   ;;  %s2278_s28 = smov %s2280_s30 }
 0x36b   :  { %18 = sbr.rel (!%p16_p6) target bundleno = 2 (0x2), region = 109 }

</bundles_post_ra>
